<compile_context>
chip_gen: v6e
topology: v6e:2x2x1
jax: 0.10.0
libtpu: 0.0.40
codegen_flags: <defaults>
</compile_context>

<pallas_src>
import functools

import jax
import jax.numpy as jnp
from jax.experimental import pallas as pl
from jax.experimental.pallas import tpu as pltpu


# Activation/IO dtype of the Pallas conv slabs.  Kept f32 so the strict f32
# reference check passes; flip to jnp.bfloat16 on v6e/v7x for ~2x MXU
# throughput and half the VMEM/HBM slab traffic (accumulation stays f32 via
# preferred_element_type).
ACT_DTYPE = jnp.float32

BACKBONE_CH = (8, 16, 32)
FPN_CH = 16
NUM_CLASSES = 4
REG_MAX = 7
HEAD_OUT = NUM_CLASSES + 4 * (REG_MAX + 1)   # 36


def _round_up(v, m):
    return ((v + m - 1) // m) * m


# ---------------------------------------------------------------------------
# Pallas kernel: single-GEMM im2col conv (+ optional chained 1x1 conv)
# ---------------------------------------------------------------------------
# One grid step = (level, image).
#   x_ref  : (P*Cp, Mpad)   polyphase, zero-padded, flattened input slab
#   w1_ref : (C1, k*k*Cp)   GEMM-layout weights (tap-major, Cin-minor)
#   b1_ref : (C1, 1)
#   [w2_ref: (C2, C1), b2_ref: (C2, 1)]   optional chained 1x1 conv
#   outputs: (C1, M) and/or (C2, M), M a multiple of 128 (lane-dense stores)
#
# The k*k tap slices are stacked along the contraction axis and contracted in
# ONE MXU GEMM.  Positions past the valid width/height read zero/garbage data
# that the wrapper discards, so every slice is static, rectangular, in-bounds.

def _conv_gemm_kernel(*refs, taps, cin, m, relu1, chain, emit_first):
    if chain:
        x_ref, w1_ref, b1_ref, w2_ref, b2_ref = refs[:5]
        out_refs = refs[5:]
    else:
        x_ref, w1_ref, b1_ref = refs[:3]
        out_refs = refs[3:]

    chunks = [x_ref[r0:r0 + cin, c0:c0 + m] for (r0, c0) in taps]
    xk = chunks[0] if len(chunks) == 1 else jnp.concatenate(chunks, axis=0)
    h = jnp.dot(w1_ref[...], xk, preferred_element_type=jnp.float32)
    h = h + b1_ref[...]
    if relu1:
        h = jnp.maximum(h, 0.0)

    idx = 0
    if emit_first:
        out_refs[idx][...] = h.astype(out_refs[idx].dtype)
        idx += 1
    if chain:                       # chained 1x1 conv; h never leaves VMEM
        o2 = jnp.dot(w2_ref[...], h.astype(w2_ref.dtype),
                     preferred_element_type=jnp.float32) + b2_ref[...]
        out_refs[idx][...] = o2.astype(out_refs[idx].dtype)


# ---------------------------------------------------------------------------
# Wrapper-side slab preparation (XLA glue) + pallas_call driver
# ---------------------------------------------------------------------------

def _prep_slab(x_nchw, k, stride, canvas_hw=None):
    """Polyphase + zero-pad + flatten an NCHW tensor into a GEMM-ready slab.

    Returns (slab, geom):
      slab : (N, stride*stride*Cp, Mpad) slab (phase-major, channel-minor)
      geom : static geometry (tap offsets, output sizes, ...) -- identical for
             all tensors prepared with the same (k, stride, canvas, Cp).
    """
    N, C, H, W = x_nchw.shape
    s = stride
    pad = k // 2
    assert 1 <= s <= k               # halo/wrap trick requires stride <= k

    xp = jnp.pad(x_nchw, ((0, 0), (0, 0), (pad, pad), (pad, pad)))
    Hp, Wp = H + 2 * pad, W + 2 * pad
    if canvas_hw is not None:        # embed small levels in a shared canvas
        Hc, Wc = canvas_hw
        xp = jnp.pad(xp, ((0, 0), (0, 0), (0, Hc - Hp), (0, Wc - Wp)))
        Hp, Wp = Hc, Wc

    Cp = _round_up(C, 8)             # sublane-aligned tap chunks
    if Cp != C:
        xp = jnp.pad(xp, ((0, 0), (0, Cp - C), (0, 0), (0, 0)))
    Hs, Ws = _round_up(Hp, s), _round_up(Wp, s)
    if (Hs, Ws) != (Hp, Wp):
        xp = jnp.pad(xp, ((0, 0), (0, 0), (0, Hs - Hp), (0, Ws - Wp)))

    Hph, Wph = Hs // s, Ws // s
    Mph = Hph * Wph
    # Polyphase split: phase (a, b) holds xp[..., a::s, b::s].
    xr = xp.reshape(N, Cp, Hph, s, Wph, s)
    xr = jnp.transpose(xr, (0, 3, 5, 1, 2, 4))       # (N, a, b, Cp, Hph, Wph)
    slab = xr.reshape(N, s * s * Cp, Mph)

    m_rows = (Hp - k) // s + 1                       # output rows computed
    m_valid = m_rows * Wph
    m_out = _round_up(m_valid, 128)                  # lane-dense output stores
    halo = ((k - 1) // s) * Wph + (k - 1) // s       # max tap start offset
    mpad = max(Mph, halo + m_out)
    if mpad != Mph:
        slab = jnp.pad(slab, ((0, 0), (0, 0), (0, mpad - Mph)))

    taps = tuple((((dy % s) * s + (dx % s)) * Cp,    # row offset (phase slab)
                  (dy // s) * Wph + (dx // s))       # flattened column start
                 for dy in range(k) for dx in range(k))
    geom = dict(cp=Cp, taps=taps, m_out=m_out, m_rows=m_rows, wph=Wph,
                ho=(H + 2 * pad - k) // s + 1, wo=(W + 2 * pad - k) // s + 1)
    return slab.astype(ACT_DTYPE), geom


def _extract(out_cm, geom):
    """(..., C, M) GEMM output -> (..., C, ho, wo) NCHW feature map."""
    lead = out_cm.shape[:-1]
    o = out_cm[..., :geom["m_rows"] * geom["wph"]]
    o = o.reshape(*lead, geom["m_rows"], geom["wph"])
    return o[..., :geom["ho"], :geom["wo"]]


def conv_gemm_call(slab_l, geom, w1, b1, *, relu=False, w2=None, b2=None,
                   emit_first=True, per_level_weights=False, out_dtype=None):
    """Run the fused conv kernel over a (level, image) grid.

    slab_l : (L, N, P*Cp, Mpad) stacked slabs (one geometry for all levels)
    w1, b1 : (L or 1, C1, k*k*Cp) GEMM-layout weights / (L or 1, C1, 1) bias
    w2, b2 : optional chained 1x1 conv (shared across levels)
    """
    out_dtype = ACT_DTYPE if out_dtype is None else out_dtype
    L, N, PC, Mpad = slab_l.shape
    _, C1, K = w1.shape
    chain = w2 is not None
    assert emit_first or chain

    wmap = (lambda l, n: (l, 0, 0)) if per_level_weights else (lambda l, n: (0, 0, 0))
    in_list = [slab_l, w1, b1]
    in_specs = [
        pl.BlockSpec((None, None, PC, Mpad), lambda l, n: (l, n, 0, 0)),
        pl.BlockSpec((None, C1, K), wmap),
        pl.BlockSpec((None, C1, 1), wmap),
    ]
    m = geom["m_out"]
    out_shape, out_specs = [], []
    if emit_first:
        out_shape.append(jax.ShapeDtypeStruct((L, N, C1, m), out_dtype))
        out_specs.append(pl.BlockSpec((None, None, C1, m), lambda l, n: (l, n, 0, 0)))
    if chain:
        C2 = w2.shape[0]
        in_list += [w2, b2]
        in_specs += [pl.BlockSpec((C2, C1), lambda l, n: (0, 0)),
                     pl.BlockSpec((C2, 1), lambda l, n: (0, 0))]
        out_shape.append(jax.ShapeDtypeStruct((L, N, C2, m), out_dtype))
        out_specs.append(pl.BlockSpec((None, None, C2, m), lambda l, n: (l, n, 0, 0)))

    # TODO(synk): at production resolutions add a third grid axis tiling M
    # (VMEM-scratch accumulation, tiles >= 512 lanes, sized per generation's
    # scoped-VMEM budget) instead of one whole-level block per step.
    outs = pl.pallas_call(
        functools.partial(_conv_gemm_kernel, taps=geom["taps"], cin=geom["cp"],
                          m=m, relu1=relu, chain=chain, emit_first=emit_first),
        grid=(L, N),
        in_specs=in_specs,
        out_specs=out_specs,
        out_shape=out_shape,
        compiler_params=pltpu.CompilerParams(
            dimension_semantics=("parallel", "parallel")),
    )(*in_list)
    return list(outs) if isinstance(outs, (list, tuple)) else [outs]


def upsample_nearest_2x(x_nchw):
    x = jnp.repeat(x_nchw, 2, axis=2)
    return jnp.repeat(x, 2, axis=3)


# ---------------------------------------------------------------------------
# Parameters (deterministic synthetic init; GEMM layouts precomputed once)
# ---------------------------------------------------------------------------

def _conv_init(key, cout, cin, k):
    kw_, kb_ = jax.random.split(key)
    w = 0.1 * jax.random.normal(kw_, (cout, cin, k, k), dtype=jnp.float32)
    b = 0.01 * jax.random.normal(kb_, (cout,), dtype=jnp.float32)
    return {"w": w, "b": b}


def _gemm_layout(p):
    """(Cout,Cin,k,k) -> (Cout, k*k*Cp): tap-major / Cin-minor, Cin padded to 8."""
    w = p["w"]
    cout, cin, k, _ = w.shape
    cp = _round_up(cin, 8)
    wpad = jnp.pad(w, ((0, 0), (0, cp - cin), (0, 0), (0, 0)))
    wg = jnp.transpose(wpad, (2, 3, 1, 0)).reshape(k * k * cp, cout).T
    return wg, p["b"].reshape(cout, 1)


def init_params(key):
    keys = jax.random.split(key, 11)
    p = {
        "bb1": _conv_init(keys[0], BACKBONE_CH[0], 3, 3),
        "bb2": _conv_init(keys[1], BACKBONE_CH[1], BACKBONE_CH[0], 3),
        "bb3": _conv_init(keys[2], BACKBONE_CH[2], BACKBONE_CH[1], 3),
        "lat1": _conv_init(keys[3], FPN_CH, BACKBONE_CH[0], 1),
        "lat2": _conv_init(keys[4], FPN_CH, BACKBONE_CH[1], 1),
        "lat3": _conv_init(keys[5], FPN_CH, BACKBONE_CH[2], 1),
        "fpn_out1": _conv_init(keys[6], FPN_CH, FPN_CH, 3),
        "fpn_out2": _conv_init(keys[7], FPN_CH, FPN_CH, 3),
        "fpn_out3": _conv_init(keys[8], FPN_CH, FPN_CH, 3),
        "head_conv": _conv_init(keys[9], FPN_CH, FPN_CH, 3),
        "head_pred": _conv_init(keys[10], HEAD_OUT, FPN_CH, 1),
    }
    # GEMM-layout weights are built ONCE here (never per forward call).  The
    # pytree contains only arrays; static config (kernel size, channels) is
    # recovered from static shapes inside jit.
    for name in ("bb1", "bb2", "bb3", "head_conv"):
        wg, bg = _gemm_layout(p[name])
        p[name] = dict(p[name], wg=wg[None], bg=bg[None])       # (1, C1, K)
    fw, fb = zip(*(_gemm_layout(p[f"fpn_out{i}"]) for i in (1, 2, 3)))
    p["fpn_out_wg"] = jnp.stack(fw)                             # (3, C1, K)
    p["fpn_out_bg"] = jnp.stack(fb)                             # (3, C1, 1)
    for name in ("lat1", "lat2", "lat3", "head_pred"):          # chained 1x1s
        w, b = p[name]["w"], p[name]["b"]
        p[name] = dict(p[name], w2=w.reshape(w.shape[0], w.shape[1]),
                       b2=b.reshape(-1, 1))
    return p


# ---------------------------------------------------------------------------
# OneStageDetector forward: backbone -> fpn -> head  (5 pallas_calls total)
# ---------------------------------------------------------------------------

def one_stage_detector_forward(params, x_nchw):
    x = x_nchw.astype(ACT_DTYPE)
    N = x.shape[0]

    # Backbone: stride-2 3x3+ReLU convs with the FPN lateral 1x1 fused
    # in-kernel as a chained output; only strided (polyphase) positions are
    # ever computed.
    def bb_stage(inp, pc, plat, emit_feature):
        k = pc["w"].shape[-1]                       # static shape, jit-safe
        slab, geom = _prep_slab(inp, k, stride=2)
        outs = conv_gemm_call(slab[None], geom, pc["wg"], pc["bg"], relu=True,
                              w2=plat["w2"], b2=plat["b2"],
                              emit_first=emit_feature)
        maps = [_extract(o[0], geom) for o in outs]
        return (maps[0], maps[1]) if emit_feature else (None, maps[0])

    c1, l1 = bb_stage(x, params["bb1"], params["lat1"], True)
    c2, l2 = bb_stage(c1, params["bb2"], params["lat2"], True)
    _, l3 = bb_stage(c2, params["bb3"], params["lat3"], False)

    # FPN top-down merge (nearest-2x upsample + add): tiny elementwise work,
    # left to XLA where it fuses with the slab-prep padding of the next call.
    # TODO(synk): at production sizes fold the upsample+add into the slab prep
    # of the following conv to save one HBM round-trip of the finest level.
    p3 = l3
    p2 = l2 + upsample_nearest_2x(p3)
    p1 = l1 + upsample_nearest_2x(p2)

    # FPN output 3x3 convs: ONE pallas_call over all 3 levels (grid=(3, N),
    # per-level weights; small levels embedded top-left in a shared canvas).
    levels = (p1, p2, p3)
    canvas = (max(t.shape[2] for t in levels) + 2,
              max(t.shape[3] for t in levels) + 2)
    slabs, geoms = zip(*(_prep_slab(t, 3, 1, canvas_hw=canvas) for t in levels))
    o = conv_gemm_call(jnp.stack(slabs), geoms[0], params["fpn_out_wg"],
                       params["fpn_out_bg"], per_level_weights=True)[0]
    o_levels = [_extract(o[i], geoms[i]) for i in range(3)]

    # Head: shared 3x3+ReLU conv and 1x1 prediction conv fused into ONE
    # pallas_call over all 3 levels; the 16-ch intermediate stays in VMEM.
    slabs, geoms = zip(*(_prep_slab(t, 3, 1, canvas_hw=canvas) for t in o_levels))
    pred = conv_gemm_call(jnp.stack(slabs), geoms[0], params["head_conv"]["wg"],
                          params["head_conv"]["bg"], relu=True,
                          w2=params["head_pred"]["w2"],
                          b2=params["head_pred"]["b2"], emit_first=False)[0]
    outs = []
    for i in range(3):
        pr = _extract(pred[i], geoms[i])            # (N, 36, H_l, W_l)
        n, c, h, w = pr.shape
        outs.append(jnp.transpose(pr, (0, 2, 3, 1)).reshape(n, h * w, c))
    return jnp.concatenate(outs, axis=1)            # (N, total_points, 36)


# ---------------------------------------------------------------------------
# Pure-JAX reference (correctness check of the fused Pallas conv path)
# ---------------------------------------------------------------------------

def _ref_conv2d(x, p, stride=1, relu=False):
    k = p["w"].shape[-1]
    pad = k // 2
    y = jax.lax.conv_general_dilated(
        x, p["w"], window_strides=(stride, stride),
        padding=[(pad, pad), (pad, pad)],
        dimension_numbers=("NCHW", "OIHW", "NCHW"))
    y = y + p["b"].reshape(1, -1, 1, 1)
    return jnp.maximum(y, 0.0) if relu else y


def _ref_forward(p, x_nchw):
    x = x_nchw.astype(jnp.float32)
    c1 = _ref_conv2d(x, p["bb1"], 2, True)
    c2 = _ref_conv2d(c1, p["bb2"], 2, True)
    c3 = _ref_conv2d(c2, p["bb3"], 2, True)
    l1 = _ref_conv2d(c1, p["lat1"])
    l2 = _ref_conv2d(c2, p["lat2"])
    l3 = _ref_conv2d(c3, p["lat3"])
    p3 = l3
    p2 = l2 + upsample_nearest_2x(p3)
    p1 = l1 + upsample_nearest_2x(p2)
    o1 = _ref_conv2d(p1, p["fpn_out1"])
    o2 = _ref_conv2d(p2, p["fpn_out2"])
    o3 = _ref_conv2d(p3, p["fpn_out3"])
    outs = []
    for f in (o1, o2, o3):
        h = _ref_conv2d(f, p["head_conv"], 1, True)
        pr = _ref_conv2d(h, p["head_pred"])
        n, c, hh, ww = pr.shape
        outs.append(jnp.transpose(pr, (0, 2, 3, 1)).reshape(n, hh * ww, c))
    return jnp.concatenate(outs, axis=1)


# ---------------------------------------------------------------------------

if __name__ == "__main__":
    key = jax.random.PRNGKey(0)
    k_params, k_img = jax.random.split(key)

    params = init_params(k_params)
    # NCHW input, as a PyTorch OneStageDetector would receive.
    x = jax.random.normal(k_img, (2, 3, 16, 16), dtype=jnp.float32)

    preds = jax.block_until_ready(jax.jit(one_stage_detector_forward)(params, x))

    # Output: (batch, total_points = 8*8 + 4*4 + 2*2 = 84, 36)
    assert preds.shape == (2, 84, HEAD_OUT), preds.shape

    ref = jax.block_until_ready(_ref_forward(params, x))
    err = float(jnp.max(jnp.abs(preds - ref)))
    tol = 1e-3 if ACT_DTYPE == jnp.float32 else 5e-2
    assert jnp.allclose(preds, ref, atol=tol, rtol=tol), err

    # TODO(synk): head.post_process / head.loss (inference/forward_train) are
    # host-side decode/loss logic, not part of forward(); not kernelized.
    print("KERNEL_OK")
</pallas_src>

<mosaic_0001>
module attributes {stable_mosaic.version = 11 : i64} {
  func.func @_conv_gemm_kernel(%arg0: i32, %arg1: i32, %arg2: memref<1x1x32x138xf32, #tpu.memory_space<vmem>>, %arg3: memref<1x8x72xf32, #tpu.memory_space<vmem>>, %arg4: memref<1x8x1xf32, #tpu.memory_space<vmem>>, %arg5: memref<16x8xf32, #tpu.memory_space<vmem>>, %arg6: memref<16x1xf32, #tpu.memory_space<vmem>>, %arg7: memref<1x1x8x128xf32, #tpu.memory_space<vmem>>, %arg8: memref<1x1x16x128xf32, #tpu.memory_space<vmem>>) attributes {dimension_semantics = [#tpu.dimension_semantics<parallel>, #tpu.dimension_semantics<parallel>], iteration_bounds = array<i64: 1, 2>, scalar_prefetch = 0 : i64, scratch_operands = 0 : i64, tpu.core_type = #tpu.core_type<tc>, window_params = [{transform_indices = @transform_0, window_bounds = array<i64: 1, 1, 32, 138>}, {pipeline_mode = #tpu.pipeline_mode<synchronous>, transform_indices = @transform_1, window_bounds = array<i64: 1, 8, 72>}, {pipeline_mode = #tpu.pipeline_mode<synchronous>, transform_indices = @transform_2, window_bounds = array<i64: 1, 8, 1>}, {pipeline_mode = #tpu.pipeline_mode<synchronous>, transform_indices = @transform_3, window_bounds = array<i64: 16, 8>}, {pipeline_mode = #tpu.pipeline_mode<synchronous>, transform_indices = @transform_4, window_bounds = array<i64: 16, 1>}, {transform_indices = @transform_5, window_bounds = array<i64: 1, 1, 8, 128>}, {transform_indices = @transform_6, window_bounds = array<i64: 1, 1, 16, 128>}]} {
    %c0 = arith.constant 0 : index
    %c0_0 = arith.constant 0 : index
    %c0_1 = arith.constant 0 : index
    %c0_2 = arith.constant 0 : index
    %0 = vector.load %arg2[%c0, %c0_0, %c0_1, %c0_2] : memref<1x1x32x138xf32, #tpu.memory_space<vmem>>, vector<1x1x8x128xf32>
    %1 = vector.shape_cast %0 : vector<1x1x8x128xf32> to vector<8x128xf32>
    %c0_3 = arith.constant 0 : index
    %c0_4 = arith.constant 0 : index
    %c8 = arith.constant 8 : index
    %c0_5 = arith.constant 0 : index
    %2 = vector.load %arg2[%c0_3, %c0_4, %c8, %c0_5] : memref<1x1x32x138xf32, #tpu.memory_space<vmem>>, vector<1x1x8x128xf32>
    %3 = vector.shape_cast %2 : vector<1x1x8x128xf32> to vector<8x128xf32>
    %c0_6 = arith.constant 0 : index
    %c0_7 = arith.constant 0 : index
    %c0_8 = arith.constant 0 : index
    %c1 = arith.constant 1 : index
    %4 = vector.load %arg2[%c0_6, %c0_7, %c0_8, %c1] : memref<1x1x32x138xf32, #tpu.memory_space<vmem>>, vector<1x1x8x128xf32>
    %5 = vector.shape_cast %4 : vector<1x1x8x128xf32> to vector<8x128xf32>
    %c0_9 = arith.constant 0 : index
    %c0_10 = arith.constant 0 : index
    %c16 = arith.constant 16 : index
    %c0_11 = arith.constant 0 : index
    %6 = vector.load %arg2[%c0_9, %c0_10, %c16, %c0_11] : memref<1x1x32x138xf32, #tpu.memory_space<vmem>>, vector<1x1x8x128xf32>
    %7 = vector.shape_cast %6 : vector<1x1x8x128xf32> to vector<8x128xf32>
    %c0_12 = arith.constant 0 : index
    %c0_13 = arith.constant 0 : index
    %c24 = arith.constant 24 : index
    %c0_14 = arith.constant 0 : index
    %8 = vector.load %arg2[%c0_12, %c0_13, %c24, %c0_14] : memref<1x1x32x138xf32, #tpu.memory_space<vmem>>, vector<1x1x8x128xf32>
    %9 = vector.shape_cast %8 : vector<1x1x8x128xf32> to vector<8x128xf32>
    %c0_15 = arith.constant 0 : index
    %c0_16 = arith.constant 0 : index
    %c16_17 = arith.constant 16 : index
    %c1_18 = arith.constant 1 : index
    %10 = vector.load %arg2[%c0_15, %c0_16, %c16_17, %c1_18] : memref<1x1x32x138xf32, #tpu.memory_space<vmem>>, vector<1x1x8x128xf32>
    %11 = vector.shape_cast %10 : vector<1x1x8x128xf32> to vector<8x128xf32>
    %c0_19 = arith.constant 0 : index
    %c0_20 = arith.constant 0 : index
    %c0_21 = arith.constant 0 : index
    %c9 = arith.constant 9 : index
    %12 = vector.load %arg2[%c0_19, %c0_20, %c0_21, %c9] : memref<1x1x32x138xf32, #tpu.memory_space<vmem>>, vector<1x1x8x128xf32>
    %13 = vector.shape_cast %12 : vector<1x1x8x128xf32> to vector<8x128xf32>
    %c0_22 = arith.constant 0 : index
    %c0_23 = arith.constant 0 : index
    %c8_24 = arith.constant 8 : index
    %c9_25 = arith.constant 9 : index
    %14 = vector.load %arg2[%c0_22, %c0_23, %c8_24, %c9_25] : memref<1x1x32x138xf32, #tpu.memory_space<vmem>>, vector<1x1x8x128xf32>
    %15 = vector.shape_cast %14 : vector<1x1x8x128xf32> to vector<8x128xf32>
    %c0_26 = arith.constant 0 : index
    %c0_27 = arith.constant 0 : index
    %c0_28 = arith.constant 0 : index
    %c10 = arith.constant 10 : index
    %16 = vector.load %arg2[%c0_26, %c0_27, %c0_28, %c10] : memref<1x1x32x138xf32, #tpu.memory_space<vmem>>, vector<1x1x8x128xf32>
    %17 = vector.shape_cast %16 : vector<1x1x8x128xf32> to vector<8x128xf32>
    %18 = tpu.concatenate %1, %3, %5, %7, %9, %11, %13, %15, %17 in 0 : vector<8x128xf32>, vector<8x128xf32>, vector<8x128xf32>, vector<8x128xf32>, vector<8x128xf32>, vector<8x128xf32>, vector<8x128xf32>, vector<8x128xf32>, vector<8x128xf32> -> vector<72x128xf32>
    %c0_29 = arith.constant 0 : index
    %c0_30 = arith.constant 0 : index
    %c0_31 = arith.constant 0 : index
    %19 = vector.load %arg3[%c0_29, %c0_30, %c0_31] : memref<1x8x72xf32, #tpu.memory_space<vmem>>, vector<1x8x72xf32>
    %20 = vector.shape_cast %19 : vector<1x8x72xf32> to vector<8x72xf32>
    %cst = arith.constant dense<0.000000e+00> : vector<8x128xf32>
    %21 = tpu.matmul %20, %18, %cst {dimension_numbers = #tpu.dot_dimension_numbers<[1], [0], [0], [1], [0, 0, 1, 1], [], []>} : vector<8x72xf32>, vector<72x128xf32>, vector<8x128xf32> -> vector<8x128xf32>
    %c0_32 = arith.constant 0 : index
    %c0_33 = arith.constant 0 : index
    %c0_34 = arith.constant 0 : index
    %22 = vector.load %arg4[%c0_32, %c0_33, %c0_34] : memref<1x8x1xf32, #tpu.memory_space<vmem>>, vector<1x8x1xf32>
    %23 = vector.shape_cast %22 : vector<1x8x1xf32> to vector<8x1xf32>
    %24 = vector.broadcast %23 : vector<8x1xf32> to vector<8x128xf32>
    %25 = arith.addf %21, %24 : vector<8x128xf32>
    %cst_35 = arith.constant 0.000000e+00 : f32
    %26 = vector.broadcast %cst_35 : f32 to vector<8x128xf32>
    %27 = arith.maximumf %25, %26 : vector<8x128xf32>
    %c0_36 = arith.constant 0 : index
    %c0_37 = arith.constant 0 : index
    %c0_38 = arith.constant 0 : index
    %c0_39 = arith.constant 0 : index
    %28 = vector.load %arg7[%c0_36, %c0_37, %c0_38, %c0_39] : memref<1x1x8x128xf32, #tpu.memory_space<vmem>>, vector<1x1x8x128xf32>
    %29 = vector.shape_cast %28 : vector<1x1x8x128xf32> to vector<8x128xf32>
    %30 = vector.shape_cast %27 : vector<8x128xf32> to vector<1x1x8x128xf32>
    tpu.vector_store %arg7[%c0_36, %c0_37, %c0_38, %c0_39], %30 {strides = array<i32>} : memref<1x1x8x128xf32, #tpu.memory_space<vmem>>, vector<1x1x8x128xf32>,
    %c0_40 = arith.constant 0 : index
    %c0_41 = arith.constant 0 : index
    %31 = vector.load %arg5[%c0_40, %c0_41] : memref<16x8xf32, #tpu.memory_space<vmem>>, vector<16x8xf32>
    %cst_42 = arith.constant dense<0.000000e+00> : vector<16x128xf32>
    %32 = tpu.matmul %31, %27, %cst_42 {dimension_numbers = #tpu.dot_dimension_numbers<[1], [0], [0], [1], [0, 0, 1, 1], [], []>} : vector<16x8xf32>, vector<8x128xf32>, vector<16x128xf32> -> vector<16x128xf32>
    %c0_43 = arith.constant 0 : index
    %c0_44 = arith.constant 0 : index
    %33 = vector.load %arg6[%c0_43, %c0_44] : memref<16x1xf32, #tpu.memory_space<vmem>>, vector<16x1xf32>
    %34 = vector.broadcast %33 : vector<16x1xf32> to vector<16x128xf32>
    %35 = arith.addf %32, %34 : vector<16x128xf32>
    %c0_45 = arith.constant 0 : index
    %c0_46 = arith.constant 0 : index
    %c0_47 = arith.constant 0 : index
    %c0_48 = arith.constant 0 : index
    %36 = vector.load %arg8[%c0_45, %c0_46, %c0_47, %c0_48] : memref<1x1x16x128xf32, #tpu.memory_space<vmem>>, vector<1x1x16x128xf32>
    %37 = vector.shape_cast %36 : vector<1x1x16x128xf32> to vector<16x128xf32>
    %38 = vector.shape_cast %35 : vector<16x128xf32> to vector<1x1x16x128xf32>
    tpu.vector_store %arg8[%c0_45, %c0_46, %c0_47, %c0_48], %38 {strides = array<i32>} : memref<1x1x16x128xf32, #tpu.memory_space<vmem>>, vector<1x1x16x128xf32>,
    return
  }
  func.func @transform_0(%arg0: i32, %arg1: i32) -> (i32, i32, i32, i32) {
    %c0_i32 = arith.constant 0 : i32
    %c0_i32_0 = arith.constant 0 : i32
    %c0_i32_1 = arith.constant 0 : i32
    return %arg0, %arg1, %c0_i32, %c0_i32_0 : i32, i32, i32, i32
  }
  func.func @transform_1(%arg0: i32, %arg1: i32) -> (i32, i32, i32) {
    %c0_i32 = arith.constant 0 : i32
    %c0_i32_0 = arith.constant 0 : i32
    %c0_i32_1 = arith.constant 0 : i32
    %c0_i32_2 = arith.constant 0 : i32
    return %c0_i32, %c0_i32_0, %c0_i32_1 : i32, i32, i32
  }
  func.func @transform_2(%arg0: i32, %arg1: i32) -> (i32, i32, i32) {
    %c0_i32 = arith.constant 0 : i32
    %c0_i32_0 = arith.constant 0 : i32
    %c0_i32_1 = arith.constant 0 : i32
    %c0_i32_2 = arith.constant 0 : i32
    return %c0_i32, %c0_i32_0, %c0_i32_1 : i32, i32, i32
  }
  func.func @transform_3(%arg0: i32, %arg1: i32) -> (i32, i32) {
    %c0_i32 = arith.constant 0 : i32
    %c0_i32_0 = arith.constant 0 : i32
    %c0_i32_1 = arith.constant 0 : i32
    return %c0_i32, %c0_i32_0 : i32, i32
  }
  func.func @transform_4(%arg0: i32, %arg1: i32) -> (i32, i32) {
    %c0_i32 = arith.constant 0 : i32
    %c0_i32_0 = arith.constant 0 : i32
    %c0_i32_1 = arith.constant 0 : i32
    return %c0_i32, %c0_i32_0 : i32, i32
  }
  func.func @transform_5(%arg0: i32, %arg1: i32) -> (i32, i32, i32, i32) {
    %c0_i32 = arith.constant 0 : i32
    %c0_i32_0 = arith.constant 0 : i32
    %c0_i32_1 = arith.constant 0 : i32
    return %arg0, %arg1, %c0_i32, %c0_i32_0 : i32, i32, i32, i32
  }
  func.func @transform_6(%arg0: i32, %arg1: i32) -> (i32, i32, i32, i32) {
    %c0_i32 = arith.constant 0 : i32
    %c0_i32_0 = arith.constant 0 : i32
    %c0_i32_1 = arith.constant 0 : i32
    return %arg0, %arg1, %c0_i32, %c0_i32_0 : i32, i32, i32, i32
  }
}

module attributes {stable_mosaic.version = 11 : i64} {
  func.func @_conv_gemm_kernel(%arg0: i32, %arg1: i32, %arg2: memref<1x1x32x134xf32, #tpu.memory_space<vmem>>, %arg3: memref<1x16x72xf32, #tpu.memory_space<vmem>>, %arg4: memref<1x16x1xf32, #tpu.memory_space<vmem>>, %arg5: memref<16x16xf32, #tpu.memory_space<vmem>>, %arg6: memref<16x1xf32, #tpu.memory_space<vmem>>, %arg7: memref<1x1x16x128xf32, #tpu.memory_space<vmem>>, %arg8: memref<1x1x16x128xf32, #tpu.memory_space<vmem>>) attributes {dimension_semantics = [#tpu.dimension_semantics<parallel>, #tpu.dimension_semantics<parallel>], iteration_bounds = array<i64: 1, 2>, scalar_prefetch = 0 : i64, scratch_operands = 0 : i64, tpu.core_type = #tpu.core_type<tc>, window_params = [{transform_indices = @transform_0, window_bounds = array<i64: 1, 1, 32, 134>}, {pipeline_mode = #tpu.pipeline_mode<synchronous>, transform_indices = @transform_1, window_bounds = array<i64: 1, 16, 72>}, {pipeline_mode = #tpu.pipeline_mode<synchronous>, transform_indices = @transform_2, window_bounds = array<i64: 1, 16, 1>}, {pipeline_mode = #tpu.pipeline_mode<synchronous>, transform_indices = @transform_3, window_bounds = array<i64: 16, 16>}, {pipeline_mode = #tpu.pipeline_mode<synchronous>, transform_indices = @transform_4, window_bounds = array<i64: 16, 1>}, {transform_indices = @transform_5, window_bounds = array<i64: 1, 1, 16, 128>}, {transform_indices = @transform_6, window_bounds = array<i64: 1, 1, 16, 128>}]} {
    %c0 = arith.constant 0 : index
    %c0_0 = arith.constant 0 : index
    %c0_1 = arith.constant 0 : index
    %c0_2 = arith.constant 0 : index
    %0 = vector.load %arg2[%c0, %c0_0, %c0_1, %c0_2] : memref<1x1x32x134xf32, #tpu.memory_space<vmem>>, vector<1x1x8x128xf32>
    %1 = vector.shape_cast %0 : vector<1x1x8x128xf32> to vector<8x128xf32>
    %c0_3 = arith.constant 0 : index
    %c0_4 = arith.constant 0 : index
    %c8 = arith.constant 8 : index
    %c0_5 = arith.constant 0 : index
    %2 = vector.load %arg2[%c0_3, %c0_4, %c8, %c0_5] : memref<1x1x32x134xf32, #tpu.memory_space<vmem>>, vector<1x1x8x128xf32>
    %3 = vector.shape_cast %2 : vector<1x1x8x128xf32> to vector<8x128xf32>
    %c0_6 = arith.constant 0 : index
    %c0_7 = arith.constant 0 : index
    %c0_8 = arith.constant 0 : index
    %c1 = arith.constant 1 : index
    %4 = vector.load %arg2[%c0_6, %c0_7, %c0_8, %c1] : memref<1x1x32x134xf32, #tpu.memory_space<vmem>>, vector<1x1x8x128xf32>
    %5 = vector.shape_cast %4 : vector<1x1x8x128xf32> to vector<8x128xf32>
    %c0_9 = arith.constant 0 : index
    %c0_10 = arith.constant 0 : index
    %c16 = arith.constant 16 : index
    %c0_11 = arith.constant 0 : index
    %6 = vector.load %arg2[%c0_9, %c0_10, %c16, %c0_11] : memref<1x1x32x134xf32, #tpu.memory_space<vmem>>, vector<1x1x8x128xf32>
    %7 = vector.shape_cast %6 : vector<1x1x8x128xf32> to vector<8x128xf32>
    %c0_12 = arith.constant 0 : index
    %c0_13 = arith.constant 0 : index
    %c24 = arith.constant 24 : index
    %c0_14 = arith.constant 0 : index
    %8 = vector.load %arg2[%c0_12, %c0_13, %c24, %c0_14] : memref<1x1x32x134xf32, #tpu.memory_space<vmem>>, vector<1x1x8x128xf32>
    %9 = vector.shape_cast %8 : vector<1x1x8x128xf32> to vector<8x128xf32>
    %c0_15 = arith.constant 0 : index
    %c0_16 = arith.constant 0 : index
    %c16_17 = arith.constant 16 : index
    %c1_18 = arith.constant 1 : index
    %10 = vector.load %arg2[%c0_15, %c0_16, %c16_17, %c1_18] : memref<1x1x32x134xf32, #tpu.memory_space<vmem>>, vector<1x1x8x128xf32>
    %11 = vector.shape_cast %10 : vector<1x1x8x128xf32> to vector<8x128xf32>
    %c0_19 = arith.constant 0 : index
    %c0_20 = arith.constant 0 : index
    %c0_21 = arith.constant 0 : index
    %c5 = arith.constant 5 : index
    %12 = vector.load %arg2[%c0_19, %c0_20, %c0_21, %c5] : memref<1x1x32x134xf32, #tpu.memory_space<vmem>>, vector<1x1x8x128xf32>
    %13 = vector.shape_cast %12 : vector<1x1x8x128xf32> to vector<8x128xf32>
    %c0_22 = arith.constant 0 : index
    %c0_23 = arith.constant 0 : index
    %c8_24 = arith.constant 8 : index
    %c5_25 = arith.constant 5 : index
    %14 = vector.load %arg2[%c0_22, %c0_23, %c8_24, %c5_25] : memref<1x1x32x134xf32, #tpu.memory_space<vmem>>, vector<1x1x8x128xf32>
    %15 = vector.shape_cast %14 : vector<1x1x8x128xf32> to vector<8x128xf32>
    %c0_26 = arith.constant 0 : index
    %c0_27 = arith.constant 0 : index
    %c0_28 = arith.constant 0 : index
    %c6 = arith.constant 6 : index
    %16 = vector.load %arg2[%c0_26, %c0_27, %c0_28, %c6] : memref<1x1x32x134xf32, #tpu.memory_space<vmem>>, vector<1x1x8x128xf32>
    %17 = vector.shape_cast %16 : vector<1x1x8x128xf32> to vector<8x128xf32>
    %18 = tpu.concatenate %1, %3, %5, %7, %9, %11, %13, %15, %17 in 0 : vector<8x128xf32>, vector<8x128xf32>, vector<8x128xf32>, vector<8x128xf32>, vector<8x128xf32>, vector<8x128xf32>, vector<8x128xf32>, vector<8x128xf32>, vector<8x128xf32> -> vector<72x128xf32>
    %c0_29 = arith.constant 0 : index
    %c0_30 = arith.constant 0 : index
    %c0_31 = arith.constant 0 : index
    %19 = vector.load %arg3[%c0_29, %c0_30, %c0_31] : memref<1x16x72xf32, #tpu.memory_space<vmem>>, vector<1x16x72xf32>
    %20 = vector.shape_cast %19 : vector<1x16x72xf32> to vector<16x72xf32>
    %cst = arith.constant dense<0.000000e+00> : vector<16x128xf32>
    %21 = tpu.matmul %20, %18, %cst {dimension_numbers = #tpu.dot_dimension_numbers<[1], [0], [0], [1], [0, 0, 1, 1], [], []>} : vector<16x72xf32>, vector<72x128xf32>, vector<16x128xf32> -> vector<16x128xf32>
    %c0_32 = arith.constant 0 : index
    %c0_33 = arith.constant 0 : index
    %c0_34 = arith.constant 0 : index
    %22 = vector.load %arg4[%c0_32, %c0_33, %c0_34] : memref<1x16x1xf32, #tpu.memory_space<vmem>>, vector<1x16x1xf32>
    %23 = vector.shape_cast %22 : vector<1x16x1xf32> to vector<16x1xf32>
    %24 = vector.broadcast %23 : vector<16x1xf32> to vector<16x128xf32>
    %25 = arith.addf %21, %24 : vector<16x128xf32>
    %cst_35 = arith.constant 0.000000e+00 : f32
    %26 = vector.broadcast %cst_35 : f32 to vector<16x128xf32>
    %27 = arith.maximumf %25, %26 : vector<16x128xf32>
    %c0_36 = arith.constant 0 : index
    %c0_37 = arith.constant 0 : index
    %c0_38 = arith.constant 0 : index
    %c0_39 = arith.constant 0 : index
    %28 = vector.load %arg7[%c0_36, %c0_37, %c0_38, %c0_39] : memref<1x1x16x128xf32, #tpu.memory_space<vmem>>, vector<1x1x16x128xf32>
    %29 = vector.shape_cast %28 : vector<1x1x16x128xf32> to vector<16x128xf32>
    %30 = vector.shape_cast %27 : vector<16x128xf32> to vector<1x1x16x128xf32>
    tpu.vector_store %arg7[%c0_36, %c0_37, %c0_38, %c0_39], %30 {strides = array<i32>} : memref<1x1x16x128xf32, #tpu.memory_space<vmem>>, vector<1x1x16x128xf32>,
    %c0_40 = arith.constant 0 : index
    %c0_41 = arith.constant 0 : index
    %31 = vector.load %arg5[%c0_40, %c0_41] : memref<16x16xf32, #tpu.memory_space<vmem>>, vector<16x16xf32>
    %cst_42 = arith.constant dense<0.000000e+00> : vector<16x128xf32>
    %32 = tpu.matmul %31, %27, %cst_42 {dimension_numbers = #tpu.dot_dimension_numbers<[1], [0], [0], [1], [0, 0, 1, 1], [], []>} : vector<16x16xf32>, vector<16x128xf32>, vector<16x128xf32> -> vector<16x128xf32>
    %c0_43 = arith.constant 0 : index
    %c0_44 = arith.constant 0 : index
    %33 = vector.load %arg6[%c0_43, %c0_44] : memref<16x1xf32, #tpu.memory_space<vmem>>, vector<16x1xf32>
    %34 = vector.broadcast %33 : vector<16x1xf32> to vector<16x128xf32>
    %35 = arith.addf %32, %34 : vector<16x128xf32>
    %c0_45 = arith.constant 0 : index
    %c0_46 = arith.constant 0 : index
    %c0_47 = arith.constant 0 : index
    %c0_48 = arith.constant 0 : index
    %36 = vector.load %arg8[%c0_45, %c0_46, %c0_47, %c0_48] : memref<1x1x16x128xf32, #tpu.memory_space<vmem>>, vector<1x1x16x128xf32>
    %37 = vector.shape_cast %36 : vector<1x1x16x128xf32> to vector<16x128xf32>
    %38 = vector.shape_cast %35 : vector<16x128xf32> to vector<1x1x16x128xf32>
    tpu.vector_store %arg8[%c0_45, %c0_46, %c0_47, %c0_48], %38 {strides = array<i32>} : memref<1x1x16x128xf32, #tpu.memory_space<vmem>>, vector<1x1x16x128xf32>,
    return
  }
  func.func @transform_0(%arg0: i32, %arg1: i32) -> (i32, i32, i32, i32) {
    %c0_i32 = arith.constant 0 : i32
    %c0_i32_0 = arith.constant 0 : i32
    %c0_i32_1 = arith.constant 0 : i32
    return %arg0, %arg1, %c0_i32, %c0_i32_0 : i32, i32, i32, i32
  }
  func.func @transform_1(%arg0: i32, %arg1: i32) -> (i32, i32, i32) {
    %c0_i32 = arith.constant 0 : i32
    %c0_i32_0 = arith.constant 0 : i32
    %c0_i32_1 = arith.constant 0 : i32
    %c0_i32_2 = arith.constant 0 : i32
    return %c0_i32, %c0_i32_0, %c0_i32_1 : i32, i32, i32
  }
  func.func @transform_2(%arg0: i32, %arg1: i32) -> (i32, i32, i32) {
    %c0_i32 = arith.constant 0 : i32
    %c0_i32_0 = arith.constant 0 : i32
    %c0_i32_1 = arith.constant 0 : i32
    %c0_i32_2 = arith.constant 0 : i32
    return %c0_i32, %c0_i32_0, %c0_i32_1 : i32, i32, i32
  }
  func.func @transform_3(%arg0: i32, %arg1: i32) -> (i32, i32) {
    %c0_i32 = arith.constant 0 : i32
    %c0_i32_0 = arith.constant 0 : i32
    %c0_i32_1 = arith.constant 0 : i32
    return %c0_i32, %c0_i32_0 : i32, i32
  }
  func.func @transform_4(%arg0: i32, %arg1: i32) -> (i32, i32) {
    %c0_i32 = arith.constant 0 : i32
    %c0_i32_0 = arith.constant 0 : i32
    %c0_i32_1 = arith.constant 0 : i32
    return %c0_i32, %c0_i32_0 : i32, i32
  }
  func.func @transform_5(%arg0: i32, %arg1: i32) -> (i32, i32, i32, i32) {
    %c0_i32 = arith.constant 0 : i32
    %c0_i32_0 = arith.constant 0 : i32
    %c0_i32_1 = arith.constant 0 : i32
    return %arg0, %arg1, %c0_i32, %c0_i32_0 : i32, i32, i32, i32
  }
  func.func @transform_6(%arg0: i32, %arg1: i32) -> (i32, i32, i32, i32) {
    %c0_i32 = arith.constant 0 : i32
    %c0_i32_0 = arith.constant 0 : i32
    %c0_i32_1 = arith.constant 0 : i32
    return %arg0, %arg1, %c0_i32, %c0_i32_0 : i32, i32, i32, i32
  }
}

module attributes {stable_mosaic.version = 11 : i64} {
  func.func @_conv_gemm_kernel(%arg0: i32, %arg1: i32, %arg2: memref<1x1x64x132xf32, #tpu.memory_space<vmem>>, %arg3: memref<1x32x144xf32, #tpu.memory_space<vmem>>, %arg4: memref<1x32x1xf32, #tpu.memory_space<vmem>>, %arg5: memref<16x32xf32, #tpu.memory_space<vmem>>, %arg6: memref<16x1xf32, #tpu.memory_space<vmem>>, %arg7: memref<1x1x16x128xf32, #tpu.memory_space<vmem>>) attributes {dimension_semantics = [#tpu.dimension_semantics<parallel>, #tpu.dimension_semantics<parallel>], iteration_bounds = array<i64: 1, 2>, scalar_prefetch = 0 : i64, scratch_operands = 0 : i64, tpu.core_type = #tpu.core_type<tc>, window_params = [{transform_indices = @transform_0, window_bounds = array<i64: 1, 1, 64, 132>}, {pipeline_mode = #tpu.pipeline_mode<synchronous>, transform_indices = @transform_1, window_bounds = array<i64: 1, 32, 144>}, {pipeline_mode = #tpu.pipeline_mode<synchronous>, transform_indices = @transform_2, window_bounds = array<i64: 1, 32, 1>}, {pipeline_mode = #tpu.pipeline_mode<synchronous>, transform_indices = @transform_3, window_bounds = array<i64: 16, 32>}, {pipeline_mode = #tpu.pipeline_mode<synchronous>, transform_indices = @transform_4, window_bounds = array<i64: 16, 1>}, {transform_indices = @transform_5, window_bounds = array<i64: 1, 1, 16, 128>}]} {
    %c0 = arith.constant 0 : index
    %c0_0 = arith.constant 0 : index
    %c0_1 = arith.constant 0 : index
    %c0_2 = arith.constant 0 : index
    %0 = vector.load %arg2[%c0, %c0_0, %c0_1, %c0_2] : memref<1x1x64x132xf32, #tpu.memory_space<vmem>>, vector<1x1x16x128xf32>
    %1 = vector.shape_cast %0 : vector<1x1x16x128xf32> to vector<16x128xf32>
    %c0_3 = arith.constant 0 : index
    %c0_4 = arith.constant 0 : index
    %c16 = arith.constant 16 : index
    %c0_5 = arith.constant 0 : index
    %2 = vector.load %arg2[%c0_3, %c0_4, %c16, %c0_5] : memref<1x1x64x132xf32, #tpu.memory_space<vmem>>, vector<1x1x16x128xf32>
    %3 = vector.shape_cast %2 : vector<1x1x16x128xf32> to vector<16x128xf32>
    %c0_6 = arith.constant 0 : index
    %c0_7 = arith.constant 0 : index
    %c0_8 = arith.constant 0 : index
    %c1 = arith.constant 1 : index
    %4 = vector.load %arg2[%c0_6, %c0_7, %c0_8, %c1] : memref<1x1x64x132xf32, #tpu.memory_space<vmem>>, vector<1x1x16x128xf32>
    %5 = vector.shape_cast %4 : vector<1x1x16x128xf32> to vector<16x128xf32>
    %c0_9 = arith.constant 0 : index
    %c0_10 = arith.constant 0 : index
    %c32 = arith.constant 32 : index
    %c0_11 = arith.constant 0 : index
    %6 = vector.load %arg2[%c0_9, %c0_10, %c32, %c0_11] : memref<1x1x64x132xf32, #tpu.memory_space<vmem>>, vector<1x1x16x128xf32>
    %7 = vector.shape_cast %6 : vector<1x1x16x128xf32> to vector<16x128xf32>
    %c0_12 = arith.constant 0 : index
    %c0_13 = arith.constant 0 : index
    %c48 = arith.constant 48 : index
    %c0_14 = arith.constant 0 : index
    %8 = vector.load %arg2[%c0_12, %c0_13, %c48, %c0_14] : memref<1x1x64x132xf32, #tpu.memory_space<vmem>>, vector<1x1x16x128xf32>
    %9 = vector.shape_cast %8 : vector<1x1x16x128xf32> to vector<16x128xf32>
    %c0_15 = arith.constant 0 : index
    %c0_16 = arith.constant 0 : index
    %c32_17 = arith.constant 32 : index
    %c1_18 = arith.constant 1 : index
    %10 = vector.load %arg2[%c0_15, %c0_16, %c32_17, %c1_18] : memref<1x1x64x132xf32, #tpu.memory_space<vmem>>, vector<1x1x16x128xf32>
    %11 = vector.shape_cast %10 : vector<1x1x16x128xf32> to vector<16x128xf32>
    %c0_19 = arith.constant 0 : index
    %c0_20 = arith.constant 0 : index
    %c0_21 = arith.constant 0 : index
    %c3 = arith.constant 3 : index
    %12 = vector.load %arg2[%c0_19, %c0_20, %c0_21, %c3] : memref<1x1x64x132xf32, #tpu.memory_space<vmem>>, vector<1x1x16x128xf32>
    %13 = vector.shape_cast %12 : vector<1x1x16x128xf32> to vector<16x128xf32>
    %c0_22 = arith.constant 0 : index
    %c0_23 = arith.constant 0 : index
    %c16_24 = arith.constant 16 : index
    %c3_25 = arith.constant 3 : index
    %14 = vector.load %arg2[%c0_22, %c0_23, %c16_24, %c3_25] : memref<1x1x64x132xf32, #tpu.memory_space<vmem>>, vector<1x1x16x128xf32>
    %15 = vector.shape_cast %14 : vector<1x1x16x128xf32> to vector<16x128xf32>
    %c0_26 = arith.constant 0 : index
    %c0_27 = arith.constant 0 : index
    %c0_28 = arith.constant 0 : index
    %c4 = arith.constant 4 : index
    %16 = vector.load %arg2[%c0_26, %c0_27, %c0_28, %c4] : memref<1x1x64x132xf32, #tpu.memory_space<vmem>>, vector<1x1x16x128xf32>
    %17 = vector.shape_cast %16 : vector<1x1x16x128xf32> to vector<16x128xf32>
    %18 = tpu.concatenate %1, %3, %5, %7, %9, %11, %13, %15, %17 in 0 : vector<16x128xf32>, vector<16x128xf32>, vector<16x128xf32>, vector<16x128xf32>, vector<16x128xf32>, vector<16x128xf32>, vector<16x128xf32>, vector<16x128xf32>, vector<16x128xf32> -> vector<144x128xf32>
    %c0_29 = arith.constant 0 : index
    %c0_30 = arith.constant 0 : index
    %c0_31 = arith.constant 0 : index
    %19 = vector.load %arg3[%c0_29, %c0_30, %c0_31] : memref<1x32x144xf32, #tpu.memory_space<vmem>>, vector<1x32x144xf32>
    %20 = vector.shape_cast %19 : vector<1x32x144xf32> to vector<32x144xf32>
    %cst = arith.constant dense<0.000000e+00> : vector<32x128xf32>
    %21 = tpu.matmul %20, %18, %cst {dimension_numbers = #tpu.dot_dimension_numbers<[1], [0], [0], [1], [0, 0, 1, 1], [], []>} : vector<32x144xf32>, vector<144x128xf32>, vector<32x128xf32> -> vector<32x128xf32>
    %c0_32 = arith.constant 0 : index
    %c0_33 = arith.constant 0 : index
    %c0_34 = arith.constant 0 : index
    %22 = vector.load %arg4[%c0_32, %c0_33, %c0_34] : memref<1x32x1xf32, #tpu.memory_space<vmem>>, vector<1x32x1xf32>
    %23 = vector.shape_cast %22 : vector<1x32x1xf32> to vector<32x1xf32>
    %24 = vector.broadcast %23 : vector<32x1xf32> to vector<32x128xf32>
    %25 = arith.addf %21, %24 : vector<32x128xf32>
    %cst_35 = arith.constant 0.000000e+00 : f32
    %26 = vector.broadcast %cst_35 : f32 to vector<32x128xf32>
    %27 = arith.maximumf %25, %26 : vector<32x128xf32>
    %c0_36 = arith.constant 0 : index
    %c0_37 = arith.constant 0 : index
    %28 = vector.load %arg5[%c0_36, %c0_37] : memref<16x32xf32, #tpu.memory_space<vmem>>, vector<16x32xf32>
    %cst_38 = arith.constant dense<0.000000e+00> : vector<16x128xf32>
    %29 = tpu.matmul %28, %27, %cst_38 {dimension_numbers = #tpu.dot_dimension_numbers<[1], [0], [0], [1], [0, 0, 1, 1], [], []>} : vector<16x32xf32>, vector<32x128xf32>, vector<16x128xf32> -> vector<16x128xf32>
    %c0_39 = arith.constant 0 : index
    %c0_40 = arith.constant 0 : index
    %30 = vector.load %arg6[%c0_39, %c0_40] : memref<16x1xf32, #tpu.memory_space<vmem>>, vector<16x1xf32>
    %31 = vector.broadcast %30 : vector<16x1xf32> to vector<16x128xf32>
    %32 = arith.addf %29, %31 : vector<16x128xf32>
    %c0_41 = arith.constant 0 : index
    %c0_42 = arith.constant 0 : index
    %c0_43 = arith.constant 0 : index
    %c0_44 = arith.constant 0 : index
    %33 = vector.load %arg7[%c0_41, %c0_42, %c0_43, %c0_44] : memref<1x1x16x128xf32, #tpu.memory_space<vmem>>, vector<1x1x16x128xf32>
    %34 = vector.shape_cast %33 : vector<1x1x16x128xf32> to vector<16x128xf32>
    %35 = vector.shape_cast %32 : vector<16x128xf32> to vector<1x1x16x128xf32>
    tpu.vector_store %arg7[%c0_41, %c0_42, %c0_43, %c0_44], %35 {strides = array<i32>} : memref<1x1x16x128xf32, #tpu.memory_space<vmem>>, vector<1x1x16x128xf32>,
    return
  }
  func.func @transform_0(%arg0: i32, %arg1: i32) -> (i32, i32, i32, i32) {
    %c0_i32 = arith.constant 0 : i32
    %c0_i32_0 = arith.constant 0 : i32
    %c0_i32_1 = arith.constant 0 : i32
    return %arg0, %arg1, %c0_i32, %c0_i32_0 : i32, i32, i32, i32
  }
  func.func @transform_1(%arg0: i32, %arg1: i32) -> (i32, i32, i32) {
    %c0_i32 = arith.constant 0 : i32
    %c0_i32_0 = arith.constant 0 : i32
    %c0_i32_1 = arith.constant 0 : i32
    %c0_i32_2 = arith.constant 0 : i32
    return %c0_i32, %c0_i32_0, %c0_i32_1 : i32, i32, i32
  }
  func.func @transform_2(%arg0: i32, %arg1: i32) -> (i32, i32, i32) {
    %c0_i32 = arith.constant 0 : i32
    %c0_i32_0 = arith.constant 0 : i32
    %c0_i32_1 = arith.constant 0 : i32
    %c0_i32_2 = arith.constant 0 : i32
    return %c0_i32, %c0_i32_0, %c0_i32_1 : i32, i32, i32
  }
  func.func @transform_3(%arg0: i32, %arg1: i32) -> (i32, i32) {
    %c0_i32 = arith.constant 0 : i32
    %c0_i32_0 = arith.constant 0 : i32
    %c0_i32_1 = arith.constant 0 : i32
    return %c0_i32, %c0_i32_0 : i32, i32
  }
  func.func @transform_4(%arg0: i32, %arg1: i32) -> (i32, i32) {
    %c0_i32 = arith.constant 0 : i32
    %c0_i32_0 = arith.constant 0 : i32
    %c0_i32_1 = arith.constant 0 : i32
    return %c0_i32, %c0_i32_0 : i32, i32
  }
  func.func @transform_5(%arg0: i32, %arg1: i32) -> (i32, i32, i32, i32) {
    %c0_i32 = arith.constant 0 : i32
    %c0_i32_0 = arith.constant 0 : i32
    %c0_i32_1 = arith.constant 0 : i32
    return %arg0, %arg1, %c0_i32, %c0_i32_0 : i32, i32, i32, i32
  }
}

module attributes {stable_mosaic.version = 11 : i64} {
  func.func @_conv_gemm_kernel(%arg0: i32, %arg1: i32, %arg2: memref<1x1x16x150xf32, #tpu.memory_space<vmem>>, %arg3: memref<1x16x144xf32, #tpu.memory_space<vmem>>, %arg4: memref<1x16x1xf32, #tpu.memory_space<vmem>>, %arg5: memref<1x1x16x128xf32, #tpu.memory_space<vmem>>) attributes {dimension_semantics = [#tpu.dimension_semantics<parallel>, #tpu.dimension_semantics<parallel>], iteration_bounds = array<i64: 3, 2>, scalar_prefetch = 0 : i64, scratch_operands = 0 : i64, tpu.core_type = #tpu.core_type<tc>, window_params = [{transform_indices = @transform_0, window_bounds = array<i64: 1, 1, 16, 150>}, {transform_indices = @transform_1, window_bounds = array<i64: 1, 16, 144>}, {transform_indices = @transform_2, window_bounds = array<i64: 1, 16, 1>}, {transform_indices = @transform_3, window_bounds = array<i64: 1, 1, 16, 128>}]} {
    %c0 = arith.constant 0 : index
    %c0_0 = arith.constant 0 : index
    %c0_1 = arith.constant 0 : index
    %c0_2 = arith.constant 0 : index
    %0 = vector.load %arg2[%c0, %c0_0, %c0_1, %c0_2] : memref<1x1x16x150xf32, #tpu.memory_space<vmem>>, vector<1x1x16x128xf32>
    %1 = vector.shape_cast %0 : vector<1x1x16x128xf32> to vector<16x128xf32>
    %c0_3 = arith.constant 0 : index
    %c0_4 = arith.constant 0 : index
    %c0_5 = arith.constant 0 : index
    %c1 = arith.constant 1 : index
    %2 = vector.load %arg2[%c0_3, %c0_4, %c0_5, %c1] : memref<1x1x16x150xf32, #tpu.memory_space<vmem>>, vector<1x1x16x128xf32>
    %3 = vector.shape_cast %2 : vector<1x1x16x128xf32> to vector<16x128xf32>
    %c0_6 = arith.constant 0 : index
    %c0_7 = arith.constant 0 : index
    %c0_8 = arith.constant 0 : index
    %c2 = arith.constant 2 : index
    %4 = vector.load %arg2[%c0_6, %c0_7, %c0_8, %c2] : memref<1x1x16x150xf32, #tpu.memory_space<vmem>>, vector<1x1x16x128xf32>
    %5 = vector.shape_cast %4 : vector<1x1x16x128xf32> to vector<16x128xf32>
    %c0_9 = arith.constant 0 : index
    %c0_10 = arith.constant 0 : index
    %c0_11 = arith.constant 0 : index
    %c10 = arith.constant 10 : index
    %6 = vector.load %arg2[%c0_9, %c0_10, %c0_11, %c10] : memref<1x1x16x150xf32, #tpu.memory_space<vmem>>, vector<1x1x16x128xf32>
    %7 = vector.shape_cast %6 : vector<1x1x16x128xf32> to vector<16x128xf32>
    %c0_12 = arith.constant 0 : index
    %c0_13 = arith.constant 0 : index
    %c0_14 = arith.constant 0 : index
    %c11 = arith.constant 11 : index
    %8 = vector.load %arg2[%c0_12, %c0_13, %c0_14, %c11] : memref<1x1x16x150xf32, #tpu.memory_space<vmem>>, vector<1x1x16x128xf32>
    %9 = vector.shape_cast %8 : vector<1x1x16x128xf32> to vector<16x128xf32>
    %c0_15 = arith.constant 0 : index
    %c0_16 = arith.constant 0 : index
    %c0_17 = arith.constant 0 : index
    %c12 = arith.constant 12 : index
    %10 = vector.load %arg2[%c0_15, %c0_16, %c0_17, %c12] : memref<1x1x16x150xf32, #tpu.memory_space<vmem>>, vector<1x1x16x128xf32>
    %11 = vector.shape_cast %10 : vector<1x1x16x128xf32> to vector<16x128xf32>
    %c0_18 = arith.constant 0 : index
    %c0_19 = arith.constant 0 : index
    %c0_20 = arith.constant 0 : index
    %c20 = arith.constant 20 : index
    %12 = vector.load %arg2[%c0_18, %c0_19, %c0_20, %c20] : memref<1x1x16x150xf32, #tpu.memory_space<vmem>>, vector<1x1x16x128xf32>
    %13 = vector.shape_cast %12 : vector<1x1x16x128xf32> to vector<16x128xf32>
    %c0_21 = arith.constant 0 : index
    %c0_22 = arith.constant 0 : index
    %c0_23 = arith.constant 0 : index
    %c21 = arith.constant 21 : index
    %14 = vector.load %arg2[%c0_21, %c0_22, %c0_23, %c21] : memref<1x1x16x150xf32, #tpu.memory_space<vmem>>, vector<1x1x16x128xf32>
    %15 = vector.shape_cast %14 : vector<1x1x16x128xf32> to vector<16x128xf32>
    %c0_24 = arith.constant 0 : index
    %c0_25 = arith.constant 0 : index
    %c0_26 = arith.constant 0 : index
    %c22 = arith.constant 22 : index
    %16 = vector.load %arg2[%c0_24, %c0_25, %c0_26, %c22] : memref<1x1x16x150xf32, #tpu.memory_space<vmem>>, vector<1x1x16x128xf32>
    %17 = vector.shape_cast %16 : vector<1x1x16x128xf32> to vector<16x128xf32>
    %18 = tpu.concatenate %1, %3, %5, %7, %9, %11, %13, %15, %17 in 0 : vector<16x128xf32>, vector<16x128xf32>, vector<16x128xf32>, vector<16x128xf32>, vector<16x128xf32>, vector<16x128xf32>, vector<16x128xf32>, vector<16x128xf32>, vector<16x128xf32> -> vector<144x128xf32>
    %c0_27 = arith.constant 0 : index
    %c0_28 = arith.constant 0 : index
    %c0_29 = arith.constant 0 : index
    %19 = vector.load %arg3[%c0_27, %c0_28, %c0_29] : memref<1x16x144xf32, #tpu.memory_space<vmem>>, vector<1x16x144xf32>
    %20 = vector.shape_cast %19 : vector<1x16x144xf32> to vector<16x144xf32>
    %cst = arith.constant dense<0.000000e+00> : vector<16x128xf32>
    %21 = tpu.matmul %20, %18, %cst {dimension_numbers = #tpu.dot_dimension_numbers<[1], [0], [0], [1], [0, 0, 1, 1], [], []>} : vector<16x144xf32>, vector<144x128xf32>, vector<16x128xf32> -> vector<16x128xf32>
    %c0_30 = arith.constant 0 : index
    %c0_31 = arith.constant 0 : index
    %c0_32 = arith.constant 0 : index
    %22 = vector.load %arg4[%c0_30, %c0_31, %c0_32] : memref<1x16x1xf32, #tpu.memory_space<vmem>>, vector<1x16x1xf32>
    %23 = vector.shape_cast %22 : vector<1x16x1xf32> to vector<16x1xf32>
    %24 = vector.broadcast %23 : vector<16x1xf32> to vector<16x128xf32>
    %25 = arith.addf %21, %24 : vector<16x128xf32>
    %c0_33 = arith.constant 0 : index
    %c0_34 = arith.constant 0 : index
    %c0_35 = arith.constant 0 : index
    %c0_36 = arith.constant 0 : index
    %26 = vector.load %arg5[%c0_33, %c0_34, %c0_35, %c0_36] : memref<1x1x16x128xf32, #tpu.memory_space<vmem>>, vector<1x1x16x128xf32>
    %27 = vector.shape_cast %26 : vector<1x1x16x128xf32> to vector<16x128xf32>
    %28 = vector.shape_cast %25 : vector<16x128xf32> to vector<1x1x16x128xf32>
    tpu.vector_store %arg5[%c0_33, %c0_34, %c0_35, %c0_36], %28 {strides = array<i32>} : memref<1x1x16x128xf32, #tpu.memory_space<vmem>>, vector<1x1x16x128xf32>,
    return
  }
  func.func @transform_0(%arg0: i32, %arg1: i32) -> (i32, i32, i32, i32) {
    %c0_i32 = arith.constant 0 : i32
    %c0_i32_0 = arith.constant 0 : i32
    %c0_i32_1 = arith.constant 0 : i32
    return %arg0, %arg1, %c0_i32, %c0_i32_0 : i32, i32, i32, i32
  }
  func.func @transform_1(%arg0: i32, %arg1: i32) -> (i32, i32, i32) {
    %c0_i32 = arith.constant 0 : i32
    %c0_i32_0 = arith.constant 0 : i32
    %c0_i32_1 = arith.constant 0 : i32
    return %arg0, %c0_i32, %c0_i32_0 : i32, i32, i32
  }
  func.func @transform_2(%arg0: i32, %arg1: i32) -> (i32, i32, i32) {
    %c0_i32 = arith.constant 0 : i32
    %c0_i32_0 = arith.constant 0 : i32
    %c0_i32_1 = arith.constant 0 : i32
    return %arg0, %c0_i32, %c0_i32_0 : i32, i32, i32
  }
  func.func @transform_3(%arg0: i32, %arg1: i32) -> (i32, i32, i32, i32) {
    %c0_i32 = arith.constant 0 : i32
    %c0_i32_0 = arith.constant 0 : i32
    %c0_i32_1 = arith.constant 0 : i32
    return %arg0, %arg1, %c0_i32, %c0_i32_0 : i32, i32, i32, i32
  }
}

module attributes {stable_mosaic.version = 11 : i64} {
  func.func @_conv_gemm_kernel(%arg0: i32, %arg1: i32, %arg2: memref<1x1x16x150xf32, #tpu.memory_space<vmem>>, %arg3: memref<1x16x144xf32, #tpu.memory_space<vmem>>, %arg4: memref<1x16x1xf32, #tpu.memory_space<vmem>>, %arg5: memref<36x16xf32, #tpu.memory_space<vmem>>, %arg6: memref<36x1xf32, #tpu.memory_space<vmem>>, %arg7: memref<1x1x36x128xf32, #tpu.memory_space<vmem>>) attributes {dimension_semantics = [#tpu.dimension_semantics<parallel>, #tpu.dimension_semantics<parallel>], iteration_bounds = array<i64: 3, 2>, scalar_prefetch = 0 : i64, scratch_operands = 0 : i64, tpu.core_type = #tpu.core_type<tc>, window_params = [{transform_indices = @transform_0, window_bounds = array<i64: 1, 1, 16, 150>}, {pipeline_mode = #tpu.pipeline_mode<synchronous>, transform_indices = @transform_1, window_bounds = array<i64: 1, 16, 144>}, {pipeline_mode = #tpu.pipeline_mode<synchronous>, transform_indices = @transform_2, window_bounds = array<i64: 1, 16, 1>}, {pipeline_mode = #tpu.pipeline_mode<synchronous>, transform_indices = @transform_3, window_bounds = array<i64: 36, 16>}, {pipeline_mode = #tpu.pipeline_mode<synchronous>, transform_indices = @transform_4, window_bounds = array<i64: 36, 1>}, {transform_indices = @transform_5, window_bounds = array<i64: 1, 1, 36, 128>}]} {
    %c0 = arith.constant 0 : index
    %c0_0 = arith.constant 0 : index
    %c0_1 = arith.constant 0 : index
    %c0_2 = arith.constant 0 : index
    %0 = vector.load %arg2[%c0, %c0_0, %c0_1, %c0_2] : memref<1x1x16x150xf32, #tpu.memory_space<vmem>>, vector<1x1x16x128xf32>
    %1 = vector.shape_cast %0 : vector<1x1x16x128xf32> to vector<16x128xf32>
    %c0_3 = arith.constant 0 : index
    %c0_4 = arith.constant 0 : index
    %c0_5 = arith.constant 0 : index
    %c1 = arith.constant 1 : index
    %2 = vector.load %arg2[%c0_3, %c0_4, %c0_5, %c1] : memref<1x1x16x150xf32, #tpu.memory_space<vmem>>, vector<1x1x16x128xf32>
    %3 = vector.shape_cast %2 : vector<1x1x16x128xf32> to vector<16x128xf32>
    %c0_6 = arith.constant 0 : index
    %c0_7 = arith.constant 0 : index
    %c0_8 = arith.constant 0 : index
    %c2 = arith.constant 2 : index
    %4 = vector.load %arg2[%c0_6, %c0_7, %c0_8, %c2] : memref<1x1x16x150xf32, #tpu.memory_space<vmem>>, vector<1x1x16x128xf32>
    %5 = vector.shape_cast %4 : vector<1x1x16x128xf32> to vector<16x128xf32>
    %c0_9 = arith.constant 0 : index
    %c0_10 = arith.constant 0 : index
    %c0_11 = arith.constant 0 : index
    %c10 = arith.constant 10 : index
    %6 = vector.load %arg2[%c0_9, %c0_10, %c0_11, %c10] : memref<1x1x16x150xf32, #tpu.memory_space<vmem>>, vector<1x1x16x128xf32>
    %7 = vector.shape_cast %6 : vector<1x1x16x128xf32> to vector<16x128xf32>
    %c0_12 = arith.constant 0 : index
    %c0_13 = arith.constant 0 : index
    %c0_14 = arith.constant 0 : index
    %c11 = arith.constant 11 : index
    %8 = vector.load %arg2[%c0_12, %c0_13, %c0_14, %c11] : memref<1x1x16x150xf32, #tpu.memory_space<vmem>>, vector<1x1x16x128xf32>
    %9 = vector.shape_cast %8 : vector<1x1x16x128xf32> to vector<16x128xf32>
    %c0_15 = arith.constant 0 : index
    %c0_16 = arith.constant 0 : index
    %c0_17 = arith.constant 0 : index
    %c12 = arith.constant 12 : index
    %10 = vector.load %arg2[%c0_15, %c0_16, %c0_17, %c12] : memref<1x1x16x150xf32, #tpu.memory_space<vmem>>, vector<1x1x16x128xf32>
    %11 = vector.shape_cast %10 : vector<1x1x16x128xf32> to vector<16x128xf32>
    %c0_18 = arith.constant 0 : index
    %c0_19 = arith.constant 0 : index
    %c0_20 = arith.constant 0 : index
    %c20 = arith.constant 20 : index
    %12 = vector.load %arg2[%c0_18, %c0_19, %c0_20, %c20] : memref<1x1x16x150xf32, #tpu.memory_space<vmem>>, vector<1x1x16x128xf32>
    %13 = vector.shape_cast %12 : vector<1x1x16x128xf32> to vector<16x128xf32>
    %c0_21 = arith.constant 0 : index
    %c0_22 = arith.constant 0 : index
    %c0_23 = arith.constant 0 : index
    %c21 = arith.constant 21 : index
    %14 = vector.load %arg2[%c0_21, %c0_22, %c0_23, %c21] : memref<1x1x16x150xf32, #tpu.memory_space<vmem>>, vector<1x1x16x128xf32>
    %15 = vector.shape_cast %14 : vector<1x1x16x128xf32> to vector<16x128xf32>
    %c0_24 = arith.constant 0 : index
    %c0_25 = arith.constant 0 : index
    %c0_26 = arith.constant 0 : index
    %c22 = arith.constant 22 : index
    %16 = vector.load %arg2[%c0_24, %c0_25, %c0_26, %c22] : memref<1x1x16x150xf32, #tpu.memory_space<vmem>>, vector<1x1x16x128xf32>
    %17 = vector.shape_cast %16 : vector<1x1x16x128xf32> to vector<16x128xf32>
    %18 = tpu.concatenate %1, %3, %5, %7, %9, %11, %13, %15, %17 in 0 : vector<16x128xf32>, vector<16x128xf32>, vector<16x128xf32>, vector<16x128xf32>, vector<16x128xf32>, vector<16x128xf32>, vector<16x128xf32>, vector<16x128xf32>, vector<16x128xf32> -> vector<144x128xf32>
    %c0_27 = arith.constant 0 : index
    %c0_28 = arith.constant 0 : index
    %c0_29 = arith.constant 0 : index
    %19 = vector.load %arg3[%c0_27, %c0_28, %c0_29] : memref<1x16x144xf32, #tpu.memory_space<vmem>>, vector<1x16x144xf32>
    %20 = vector.shape_cast %19 : vector<1x16x144xf32> to vector<16x144xf32>
    %cst = arith.constant dense<0.000000e+00> : vector<16x128xf32>
    %21 = tpu.matmul %20, %18, %cst {dimension_numbers = #tpu.dot_dimension_numbers<[1], [0], [0], [1], [0, 0, 1, 1], [], []>} : vector<16x144xf32>, vector<144x128xf32>, vector<16x128xf32> -> vector<16x128xf32>
    %c0_30 = arith.constant 0 : index
    %c0_31 = arith.constant 0 : index
    %c0_32 = arith.constant 0 : index
    %22 = vector.load %arg4[%c0_30, %c0_31, %c0_32] : memref<1x16x1xf32, #tpu.memory_space<vmem>>, vector<1x16x1xf32>
    %23 = vector.shape_cast %22 : vector<1x16x1xf32> to vector<16x1xf32>
    %24 = vector.broadcast %23 : vector<16x1xf32> to vector<16x128xf32>
    %25 = arith.addf %21, %24 : vector<16x128xf32>
    %cst_33 = arith.constant 0.000000e+00 : f32
    %26 = vector.broadcast %cst_33 : f32 to vector<16x128xf32>
    %27 = arith.maximumf %25, %26 : vector<16x128xf32>
    %c0_34 = arith.constant 0 : index
    %c0_35 = arith.constant 0 : index
    %28 = vector.load %arg5[%c0_34, %c0_35] : memref<36x16xf32, #tpu.memory_space<vmem>>, vector<36x16xf32>
    %cst_36 = arith.constant dense<0.000000e+00> : vector<36x128xf32>
    %29 = tpu.matmul %28, %27, %cst_36 {dimension_numbers = #tpu.dot_dimension_numbers<[1], [0], [0], [1], [0, 0, 1, 1], [], []>} : vector<36x16xf32>, vector<16x128xf32>, vector<36x128xf32> -> vector<36x128xf32>
    %c0_37 = arith.constant 0 : index
    %c0_38 = arith.constant 0 : index
    %30 = vector.load %arg6[%c0_37, %c0_38] : memref<36x1xf32, #tpu.memory_space<vmem>>, vector<36x1xf32>
    %31 = vector.broadcast %30 : vector<36x1xf32> to vector<36x128xf32>
    %32 = arith.addf %29, %31 : vector<36x128xf32>
    %c0_39 = arith.constant 0 : index
    %c0_40 = arith.constant 0 : index
    %c0_41 = arith.constant 0 : index
    %c0_42 = arith.constant 0 : index
    %33 = vector.load %arg7[%c0_39, %c0_40, %c0_41, %c0_42] : memref<1x1x36x128xf32, #tpu.memory_space<vmem>>, vector<1x1x36x128xf32>
    %34 = vector.shape_cast %33 : vector<1x1x36x128xf32> to vector<36x128xf32>
    %35 = vector.shape_cast %32 : vector<36x128xf32> to vector<1x1x36x128xf32>
    tpu.vector_store %arg7[%c0_39, %c0_40, %c0_41, %c0_42], %35 {strides = array<i32>} : memref<1x1x36x128xf32, #tpu.memory_space<vmem>>, vector<1x1x36x128xf32>,
    return
  }
  func.func @transform_0(%arg0: i32, %arg1: i32) -> (i32, i32, i32, i32) {
    %c0_i32 = arith.constant 0 : i32
    %c0_i32_0 = arith.constant 0 : i32
    %c0_i32_1 = arith.constant 0 : i32
    return %arg0, %arg1, %c0_i32, %c0_i32_0 : i32, i32, i32, i32
  }
  func.func @transform_1(%arg0: i32, %arg1: i32) -> (i32, i32, i32) {
    %c0_i32 = arith.constant 0 : i32
    %c0_i32_0 = arith.constant 0 : i32
    %c0_i32_1 = arith.constant 0 : i32
    %c0_i32_2 = arith.constant 0 : i32
    return %c0_i32, %c0_i32_0, %c0_i32_1 : i32, i32, i32
  }
  func.func @transform_2(%arg0: i32, %arg1: i32) -> (i32, i32, i32) {
    %c0_i32 = arith.constant 0 : i32
    %c0_i32_0 = arith.constant 0 : i32
    %c0_i32_1 = arith.constant 0 : i32
    %c0_i32_2 = arith.constant 0 : i32
    return %c0_i32, %c0_i32_0, %c0_i32_1 : i32, i32, i32
  }
  func.func @transform_3(%arg0: i32, %arg1: i32) -> (i32, i32) {
    %c0_i32 = arith.constant 0 : i32
    %c0_i32_0 = arith.constant 0 : i32
    %c0_i32_1 = arith.constant 0 : i32
    return %c0_i32, %c0_i32_0 : i32, i32
  }
  func.func @transform_4(%arg0: i32, %arg1: i32) -> (i32, i32) {
    %c0_i32 = arith.constant 0 : i32
    %c0_i32_0 = arith.constant 0 : i32
    %c0_i32_1 = arith.constant 0 : i32
    return %c0_i32, %c0_i32_0 : i32, i32
  }
  func.func @transform_5(%arg0: i32, %arg1: i32) -> (i32, i32, i32, i32) {
    %c0_i32 = arith.constant 0 : i32
    %c0_i32_0 = arith.constant 0 : i32
    %c0_i32_1 = arith.constant 0 : i32
    return %arg0, %arg1, %c0_i32, %c0_i32_0 : i32, i32, i32, i32
  }
}

</mosaic_0001>

<bundles_post_ra>
// kernel: one_stage_detector_forward.6
= control target key start
LH: loop header
LB: loop body
LE: loop exit
PB: predicated region body
PF: predicated region fallthrough
CT: control target
= control target key end

     0   :  { %s856_s21 = smov 0   ;;  %s858_s22 = smov 0   ;;  %s945_s0 = inlined_call_operand.vmem [shape: f32[1,2,32,134], index: 0, kind: input, shape index: {}]   ;;  %s946_s1 = inlined_call_operand.vmem [shape: f32[1,16,72], index: 1, kind: input, shape index: {}]   ;;  %s947_s2 = inlined_call_operand.vmem [shape: f32[1,16,1], index: 2, kind: input, shape index: {}]   ;;  %s948_s3 = inlined_call_operand.vmem [shape: f32[16,16], index: 3, kind: input, shape index: {}]   ;;  %s949_s4 = inlined_call_operand.vmem [shape: f32[16,1], index: 4, kind: input, shape index: {}]   ;;  %s950_s5 = inlined_call_operand.vmem [shape: f32[1,2,16,128], index: 5, kind: output, shape index: {0}]   ;;  %s951_s6 = inlined_call_operand.vmem [shape: f32[1,2,16,128], index: 6, kind: output, shape index: {1}]  }
   0x1   :  { %s860_s23 = smov 0  }
   0x2 LB: > { %s26_s24 = sadd.s32 1, %s811_s22  ;;  %p704_p0 = scmp.ge.s32.totalorder %s815_s23, 1  ;;  %s815_s23 = sphi %s860_s23, %s17_s23   ;;  %s811_s22 = sphi %s858_s22, %s953_s22   ;;  %s807_s21 = sphi %s856_s21, %s952_s21  }
   0x3   : > { %p27_p1 = scmp.ge.s32.totalorder %s26_s24, 2  ;;  %p237_p2 = scmp.lt.s32.totalorder %s815_s23, 3 }
   0x5   : > { %s955_s24 = smov (%p27_p1, %s26_s24), 0  ;;  %p238_p3 = pnand %p704_p0, %p237_p2 }
   0x6   : > { %p286_p4 = scmp.lt.s32.totalorder (!%p238_p3), %s807_s21, 1  ;;  %s817_s29 = smov (!%p238_p3), 123  }
   0x7   : > { %241 = sbr.rel (%p238_p3) target bundleno = 555 (0x22b), region = 40  ;;  %s818_s30 = smov (!%p238_p3), 122  }
   0x8   : > { %s819_s9 = smov (!%p238_p3), 127  }
   0xc   : > { %s957_s21 = smov (!%p286_p4, %s807_s21), 1  ;;  %v357_v6 = vld [vmem:[%s946_s1] sm:$0xff]  ;;  %vm371_vm0 = vcmask 588800   ;;  %v820_v7 = vmov 0   ;;  %v360_v8 = vld [vmem:[%s947_s2 + $0x8] sm:$0xff]  ;;  %vm354_vm1 = vcmask 998400  }
   0xd   : > { %s717_s25 = sshll.u32 %s957_s21, 6  ;;  %753 = vmatprep.mubr.msk.f32.mxu0 %vm371_vm0, %v357_v6  ;;  %791 = vset.pattern.permute.xlu0 %v820_v7  ;;  %v359_v9 = vld [vmem:[%s947_s2] sm:$0xff]  ;;  %v460_v10 = vld [vmem:[%s949_s4 + $0x8] sm:$0xff]  ;;  %vm339_vm2 = vcmask 1006592   ;;  %vm324_vm3 = vcmask 1039360   ;;  %vm471_vm4 = vcmask 130048  }
   0xe   : > { %s880_s28 = scalar_lea.vmem %s945_s0, %s717_s25  ;;  %792 = vset.pattern.permute.xlu1 %v820_v7  ;;  %v459_v11 = vld [vmem:[%s949_s4] sm:$0xff]  ;;  %v358_v28 = vld [vmem:[%s946_s1 + $0x8] sm:$0xff]  ;;  %s718_s26 = sshll.u32 %s957_s21, 4 }
   0xf   : > { %v883_v0 = vld [vmem:[%s880_s28 + $0x10] sm:$0xff]  ;;  %v886_v1 = vld [vmem:[%s880_s28] sm:$0xff]  ;;  %v317_v2 = vld [vmem:[%s880_s28 + $0x18] sm:$0xff] }
  0x10   : > { %344 = vrot.lane.b32.xlu1 %v883_v0, %s817_s29  ;;  %350 = vrot.lane.b32.xlu0 %v886_v1, %s818_s30  ;;  %v313_v3 = vld [vmem:[%s880_s28 + $0x8] sm:$0xff]  ;;  %v314_v5 = vld [vmem:[%s880_s28 + $0x20] sm:$0xff] }
  0x11   : > { %v316_v4 = vld [vmem:[%s880_s28 + $0x28] sm:$0xff]  ;;  %v315_v24 = vld [vmem:[%s880_s28 + $0x30] sm:$0xff]  ;;  %v457_v29 = vld [vmem:[%s948_s3] sm:$0xff] }
  0x12   : > { %760 = vmatprep.mubr.msk.f32.mxu1 %vm471_vm4, %v457_v29  ;;  %v458_v38 = vld [vmem:[%s948_s3 + $0x8] sm:$0xff] }
  0x14   : > { %346 = vrot.lane.b32.xlu1 %v317_v2, %s817_s29  ;;  %352 = vrot.lane.b32.xlu0 %v313_v3, %s818_s30 }
  0x18   : > { %337 = vrot.lane.b32.xlu1 %v313_v3, %s817_s29  ;;  %335 = vrot.lane.b32.xlu0 %v886_v1, %s817_s29  ;;  %s301_s29 = scalar_lea.vmem %s950_s5, %s718_s26 }
  0x1c   : > { %331 = vrot.lane.b32.xlu1 %v316_v4, %s819_s9  ;;  %329 = vrot.lane.b32.xlu0 %v314_v5, %s819_s9 }
  0x20   : > { %322 = vrot.lane.b32.xlu1 %v313_v3, %s819_s9  ;;  %320 = vrot.lane.b32.xlu0 %v886_v1, %s819_s9  ;;  %s310_s9 = scalar_lea.vmem %s951_s6, %s718_s26 }
  0x24   : > { %368 = vperm.xlu0 %791, %v360_v8   ;;  %363 = vperm.xlu1 %792, %v359_v9  }
  0x28   : > { %468 = vperm.xlu0 %791, %v460_v10   ;;  %463 = vperm.xlu1 %792, %v459_v11  }
  0x82   : > { %v345_v12 = vpop.permute.xlu1 %344  ;;  %v351_v13 = vpop.permute.xlu0 %350 }
  0x86   : > { %v347_v14 = vpop.permute.xlu1 %346  ;;  %v353_v15 = vpop.permute.xlu0 %352 }
  0x87   : > { %v355_v16 = vsel %vm354_vm1, %v351_v13, %v353_v15  ;;  %v348_v17 = vsel %vm339_vm2, %v345_v12, %v347_v14 }
  0x88   : > { %735 = vmatprep.subr.mxu0 %v355_v16 }
  0x89   : > { %736 = vmatpush3.msra.mxu0 %v355_v16 }
  0x8a   : > { %v338_v18 = vpop.permute.xlu1 %337  ;;  %737 = vmatprep.subr.mxu0 %v348_v17  ;;  %v336_v19 = vpop.permute.xlu0 %335 }
  0x8b   : > { %738 = vmatpush3.msra.mxu0 %v348_v17  ;;  %v340_v20 = vsel %vm339_vm2, %v336_v19, %v338_v18 }
  0x8c   : > { %739 = vmatprep.subr.mxu0 %v340_v20 }
  0x8d   : > { %740 = vmatpush3.msra.mxu0 %v340_v20 }
  0x8e   : > { %v332_v21 = vpop.permute.xlu1 %331  ;;  %v330_v22 = vpop.permute.xlu0 %329 }
  0x8f   : > { %v333_v23 = vsel %vm324_vm3, %v330_v22, %v332_v21 }
  0x90   : > { %741 = vmatprep.subr.mxu0 %v333_v23 }
  0x91   : > { %742 = vmatpush3.msra.mxu0 %v333_v23 }
  0x92   : > { %743 = vmatprep.subr.mxu0 %v315_v24  ;;  %v323_v25 = vpop.permute.xlu1 %322  ;;  %v321_v26 = vpop.permute.xlu0 %320 }
  0x93   : > { %744 = vmatpush3.msra.mxu0 %v315_v24  ;;  %v325_v27 = vsel %vm324_vm3, %v321_v26, %v323_v25 }
  0x94   : > { %745 = vmatprep.subr.mxu0 %v314_v5 }
  0x95   : > { %746 = vmatpush3.msra.mxu0 %v314_v5 }
  0x96   : > { %747 = vmatprep.subr.mxu0 %v325_v27 }
  0x97   : > { %748 = vmatpush3.msra.mxu0 %v325_v27 }
  0x98   : > { %749 = vmatprep.subr.mxu0 %v883_v0 }
  0x99   : > { %750 = vmatpush3.msra.mxu0 %v883_v0 }
  0x9a   : > { %751 = vmatprep.subr.mxu0 %v886_v1 }
  0x9b   : > { %752 = vmatpush3.msra.mxu0 %v886_v1 }
  0x9c   : > { %754 = vmatmul.mubr.msk.f32.vlgmr.msra.gmra.mxu0 %vm371_vm0, %v358_v28 }
  0x9f   : > { %v369_v30 = vpop.permute.xlu0 %368  ;;  %v364_v33 = vpop.permute.xlu1 %363 }
  0xa3   : > { %v469_v39 = vpop.permute.xlu0 %468  ;;  %v464_v42 = vpop.permute.xlu1 %463 }
 0x15c   : > { %v755_v31 = vpop.f32.mrf.mxu0 }
 0x15d   : > { %v450_v32 = vadd.f32 %v755_v31, %v369_v30 }
 0x15e   : > { %v444_v34 = vpop.f32.mrf.mxu0 }
 0x15f   : > { %v454_v35 = vmax.f32 %v450_v32, 0.0  ;;  %v445_v36 = vadd.f32 %v444_v34, %v364_v33 }
 0x161   : > { %v453_v37 = vmax.f32 %v445_v36, 0.0  ;;  %756 = vmatprep.subr.mxu1 %v454_v35  ;;  %456 = vst [vmem:[%s301_s29 + $0x8] sm:$0xff] %v454_v35 }
 0x162   : > { %757 = vmatpush3.msra.mxu1 %v454_v35 }
 0x163   : > { %758 = vmatprep.subr.mxu1 %v453_v37  ;;  %455 = vst [vmem:[%s301_s29] sm:$0xff] %v453_v37 }
 0x164   : > { %759 = vmatpush3.msra.mxu1 %v453_v37 }
 0x165   : > { %761 = vmatmul.mubr.msk.f32.vlgmr.msra.gmra.mxu1 %vm471_vm4, %v458_v38 }
 0x225   : > { %v762_v40 = vpop.f32.mrf.mxu1 }
 0x226   : > { %v550_v41 = vadd.f32 %v762_v40, %v469_v39 }
 0x227   : > { %v544_v43 = vpop.f32.mrf.mxu1 }
 0x228   : > { %554 = vst [vmem:[%s310_s9 + $0x8] sm:$0xff] %v550_v41  ;;  %v545_v44 = vadd.f32 %v544_v43, %v464_v42 }
 0x22a   : > { %553 = vst [vmem:[%s310_s9] sm:$0xff] %v545_v44 }
 0x22b PF: > { %s17_s23 = sadd.s32 1, %s815_s23   ;;  %s952_s21 = smov %s811_s22 }
 0x22c   : > { %p14_p5 = scmp.ge.s32.totalorder %s17_s23, 4   ;;  %s953_s22 = smov %s955_s24 }
 0x22e   :  { %16 = sbr.rel (!%p14_p5) target bundleno = 2 (0x2), region = 82 }

// kernel: one_stage_detector_forward.5
= control target key start
LH: loop header
LB: loop body
LE: loop exit
PB: predicated region body
PF: predicated region fallthrough
CT: control target
= control target key end

     0   :  { %s828_s21 = smov 0   ;;  %s830_s22 = smov 0   ;;  %s908_s0 = inlined_call_operand.vmem [shape: f32[1,2,32,138], index: 0, kind: input, shape index: {}]   ;;  %s909_s1 = inlined_call_operand.vmem [shape: f32[1,8,72], index: 1, kind: input, shape index: {}]   ;;  %s910_s2 = inlined_call_operand.vmem [shape: f32[1,8,1], index: 2, kind: input, shape index: {}]   ;;  %s911_s3 = inlined_call_operand.vmem [shape: f32[16,8], index: 3, kind: input, shape index: {}]   ;;  %s912_s4 = inlined_call_operand.vmem [shape: f32[16,1], index: 4, kind: input, shape index: {}]   ;;  %s913_s5 = inlined_call_operand.vmem [shape: f32[1,2,8,128], index: 5, kind: output, shape index: {0}]   ;;  %s914_s6 = inlined_call_operand.vmem [shape: f32[1,2,16,128], index: 6, kind: output, shape index: {1}]  }
   0x1   :  { %s832_s23 = smov 0  }
   0x2 LB: > { %s26_s24 = sadd.s32 1, %s781_s22  ;;  %p679_p0 = scmp.ge.s32.totalorder %s785_s23, 1  ;;  %s785_s23 = sphi %s832_s23, %s17_s23   ;;  %s781_s22 = sphi %s830_s22, %s916_s22   ;;  %s777_s21 = sphi %s828_s21, %s915_s21  }
   0x3   : > { %p27_p1 = scmp.ge.s32.totalorder %s26_s24, 2  ;;  %p237_p2 = scmp.lt.s32.totalorder %s785_s23, 3 }
   0x5   : > { %s918_s24 = smov (%p27_p1, %s26_s24), 0  ;;  %p238_p3 = pnand %p679_p0, %p237_p2 }
   0x6   : > { %p285_p4 = scmp.lt.s32.totalorder (!%p238_p3), %s777_s21, 1  ;;  %s788_s29 = smov (!%p238_p3), 119  }
   0x7   : > { %241 = sbr.rel (%p238_p3) target bundleno = 552 (0x228), region = 40  ;;  %s789_s30 = smov (!%p238_p3), 118  }
   0x8   : > { %s791_s7 = smov (!%p238_p3), 127  }
   0xc   : > { %v787_v0 = vmov 0.0   ;;  %s920_s21 = smov (!%p285_p4, %s777_s21), 1  ;;  %vm790_vm0 = vmmov 0   ;;  %v792_v7 = vmov 0   ;;  %v356_v8 = vld [vmem:[%s910_s2] sm:$0xff]  ;;  %vm352_vm1 = vcmask 965632  }
   0xd   : > { %705 = vmatprep.subr.mxu0 %v787_v0  ;;  %s690_s25 = sshll.u32 %s920_s21, 6  ;;  %723 = vmatprep.mubr.msk.f32.mxu0 %vm790_vm0, %v787_v0  ;;  %vm337_vm2 = vcmask 973824   ;;  %vm322_vm3 = vcmask 1039360   ;;  %v355_v25 = vld [vmem:[%s909_s1] sm:$0xff]  ;;  %vm362_vm4 = vcmask 588800   ;;  %vm452_vm5 = vcmask 64512  }
   0xe   : > { %s853_s28 = scalar_lea.vmem %s908_s0, %s690_s25  ;;  %761 = vset.pattern.permute.xlu0 %v792_v7  ;;  %762 = vset.pattern.permute.xlu1 %v792_v7  ;;  %v438_v26 = vld [vmem:[%s911_s3] sm:$0xff]  ;;  %v441_v28 = vld [vmem:[%s912_s4 + $0x8] sm:$0xff]  ;;  %s682_s18 = sshll.u32 %s920_s21, 3 }
   0xf   : > { %v310_v1 = vld [vmem:[%s853_s28 + $0x10] sm:$0xff]  ;;  %v309_v2 = vld [vmem:[%s853_s28] sm:$0xff]  ;;  %v315_v3 = vld [vmem:[%s853_s28 + $0x18] sm:$0xff]  ;;  %728 = vmatprep.mubr.msk.f32.mxu1 %vm452_vm5, %v438_v26  ;;  %s299_s25 = scalar_lea.vmem %s913_s5, %s682_s18 }
  0x10   : > { %342 = vrot.lane.b32.xlu1 %v310_v1, %s788_s29  ;;  %348 = vrot.lane.b32.xlu0 %v309_v2, %s789_s30  ;;  %v311_v4 = vld [vmem:[%s853_s28 + $0x8] sm:$0xff]  ;;  %v312_v6 = vld [vmem:[%s853_s28 + $0x20] sm:$0xff] }
  0x11   : > { %v314_v5 = vld [vmem:[%s853_s28 + $0x28] sm:$0xff]  ;;  %v313_v21 = vld [vmem:[%s853_s28 + $0x30] sm:$0xff]  ;;  %v440_v27 = vld [vmem:[%s912_s4] sm:$0xff]  ;;  %s691_s28 = sshll.u32 %s920_s21, 4 }
  0x12   : > { %v439_v34 = vld [vmem:[%s911_s3 + $0x8] sm:$0xff] }
  0x14   : > { %344 = vrot.lane.b32.xlu1 %v315_v3, %s788_s29  ;;  %350 = vrot.lane.b32.xlu0 %v311_v4, %s789_s30 }
  0x18   : > { %335 = vrot.lane.b32.xlu1 %v311_v4, %s788_s29  ;;  %333 = vrot.lane.b32.xlu0 %v309_v2, %s788_s29 }
  0x1c   : > { %329 = vrot.lane.b32.xlu1 %v314_v5, %s791_s7  ;;  %327 = vrot.lane.b32.xlu0 %v312_v6, %s791_s7 }
  0x20   : > { %320 = vrot.lane.b32.xlu1 %v311_v4, %s791_s7  ;;  %318 = vrot.lane.b32.xlu0 %v309_v2, %s791_s7  ;;  %s308_s7 = scalar_lea.vmem %s914_s6, %s691_s28 }
  0x24   : > { %359 = vperm.xlu0 %761, %v356_v8   ;;  %444 = vperm.xlu1 %762, %v440_v27  }
  0x28   : > { %449 = vperm.xlu1 %762, %v441_v28  }
  0x82   : > { %v343_v9 = vpop.permute.xlu1 %342  ;;  %v349_v10 = vpop.permute.xlu0 %348 }
  0x86   : > { %v345_v11 = vpop.permute.xlu1 %344  ;;  %v351_v12 = vpop.permute.xlu0 %350 }
  0x87   : > { %v353_v13 = vsel %vm352_vm1, %v349_v10, %v351_v12  ;;  %v346_v14 = vsel %vm337_vm2, %v343_v9, %v345_v11 }
  0x88   : > { %706 = vmatpush3.msra.mxu0 %v353_v13 }
  0x89   : > { %707 = vmatprep.subr.mxu0 %v787_v0 }
  0x8a   : > { %v336_v15 = vpop.permute.xlu1 %335  ;;  %708 = vmatpush3.msra.mxu0 %v346_v14  ;;  %v334_v16 = vpop.permute.xlu0 %333 }
  0x8b   : > { %709 = vmatprep.subr.mxu0 %v787_v0  ;;  %v338_v17 = vsel %vm337_vm2, %v334_v16, %v336_v15 }
  0x8c   : > { %710 = vmatpush3.msra.mxu0 %v338_v17 }
  0x8d   : > { %711 = vmatprep.subr.mxu0 %v787_v0 }
  0x8e   : > { %v330_v18 = vpop.permute.xlu1 %329  ;;  %v328_v19 = vpop.permute.xlu0 %327 }
  0x8f   : > { %v331_v20 = vsel %vm322_vm3, %v328_v19, %v330_v18 }
  0x90   : > { %712 = vmatpush3.msra.mxu0 %v331_v20 }
  0x91   : > { %713 = vmatprep.subr.mxu0 %v787_v0 }
  0x92   : > { %714 = vmatpush3.msra.mxu0 %v313_v21  ;;  %v321_v22 = vpop.permute.xlu1 %320  ;;  %v319_v23 = vpop.permute.xlu0 %318 }
  0x93   : > { %715 = vmatprep.subr.mxu0 %v787_v0  ;;  %v323_v24 = vsel %vm322_vm3, %v319_v23, %v321_v22 }
  0x94   : > { %716 = vmatpush3.msra.mxu0 %v312_v6 }
  0x95   : > { %717 = vmatprep.subr.mxu0 %v787_v0 }
  0x96   : > { %718 = vmatpush3.msra.mxu0 %v323_v24 }
  0x97   : > { %719 = vmatprep.subr.mxu0 %v787_v0 }
  0x98   : > { %720 = vmatpush3.msra.mxu0 %v310_v1 }
  0x99   : > { %721 = vmatprep.subr.mxu0 %v787_v0 }
  0x9a   : > { %722 = vmatpush3.msra.mxu0 %v309_v2 }
  0x9b   : > { %724 = vmatmul.mubr.msk.f32.vlgmr.msra.gmra.mxu0 %vm362_vm4, %v355_v25 }
  0x9f   : > { %v360_v29 = vpop.permute.xlu0 %359  ;;  %v445_v35 = vpop.permute.xlu1 %444 }
  0xa3   : > { %v450_v36 = vpop.permute.xlu1 %449 }
 0x15b   : > { %v432_v30 = vpop.f32.mrf.mxu0 }
 0x15c   : > { %v433_v31 = vadd.f32 %v432_v30, %v360_v29 }
 0x15d   : > { %v725_v32 = vpop.f32.mrf.mxu0 }
 0x15e   : > { %v436_v33 = vmax.f32 %v433_v31, 0.0 }
 0x160   : > { %437 = vst [vmem:[%s299_s25] sm:$0xff] %v436_v33  ;;  %726 = vmatprep.subr.mxu1 %v436_v33 }
 0x161   : > { %727 = vmatpush3.msra.mxu1 %v436_v33 }
 0x162   : > { %729 = vmatmul.mubr.msk.f32.vlgmr.msra.gmra.mxu1 %vm452_vm5, %v439_v34 }
 0x222   : > { %v730_v37 = vpop.f32.mrf.mxu1 }
 0x223   : > { %v531_v38 = vadd.f32 %v730_v37, %v450_v36 }
 0x224   : > { %v525_v39 = vpop.f32.mrf.mxu1 }
 0x225   : > { %535 = vst [vmem:[%s308_s7 + $0x8] sm:$0xff] %v531_v38  ;;  %v526_v40 = vadd.f32 %v525_v39, %v445_v35 }
 0x227   : > { %534 = vst [vmem:[%s308_s7] sm:$0xff] %v526_v40 }
 0x228 PF: > { %s17_s23 = sadd.s32 1, %s785_s23   ;;  %s915_s21 = smov %s781_s22 }
 0x229   : > { %p14_p5 = scmp.ge.s32.totalorder %s17_s23, 4   ;;  %s916_s22 = smov %s918_s24 }
 0x22b   :  { %16 = sbr.rel (!%p14_p5) target bundleno = 2 (0x2), region = 82 }

// kernel: one_stage_detector_forward.7
= control target key start
LH: loop header
LB: loop body
LE: loop exit
PB: predicated region body
PF: predicated region fallthrough
CT: control target
= control target key end

     0   :  { %s800_s18 = smov 0   ;;  %s802_s19 = smov 0   ;;  %s961_s0 = inlined_call_operand.vmem [shape: f32[1,2,64,132], index: 0, kind: input, shape index: {}]   ;;  %s962_s1 = inlined_call_operand.vmem [shape: f32[1,32,144], index: 1, kind: input, shape index: {}]   ;;  %s963_s2 = inlined_call_operand.vmem [shape: f32[1,32,1], index: 2, kind: input, shape index: {}]   ;;  %s964_s3 = inlined_call_operand.vmem [shape: f32[16,32], index: 3, kind: input, shape index: {}]   ;;  %s965_s4 = inlined_call_operand.vmem [shape: f32[16,1], index: 4, kind: input, shape index: {}]   ;;  %s966_s5 = inlined_call_operand.vmem [shape: f32[1,2,16,128], index: 5, kind: output, shape index: {}]  }
   0x1   :  { %s804_s20 = smov 0  }
   0x2 LB: > { %s24_s21 = sadd.s32 1, %s759_s19  ;;  %p678_p0 = scmp.ge.s32.totalorder %s763_s20, 1  ;;  %s763_s20 = sphi %s804_s20, %s15_s20   ;;  %s759_s19 = sphi %s802_s19, %s968_s19   ;;  %s755_s18 = sphi %s800_s18, %s967_s18  }
   0x3   : > { %p25_p1 = scmp.ge.s32.totalorder %s24_s21, 2  ;;  %p207_p2 = scmp.lt.s32.totalorder %s763_s20, 3 }
   0x5   : > { %s970_s21 = smov (%p25_p1, %s24_s21), 0  ;;  %p208_p3 = pnand %p678_p0, %p207_p2 }
   0x6   : > { %p245_p4 = scmp.lt.s32.totalorder (!%p208_p3), %s755_s18, 1  ;;  %s766_s26 = smov (!%p208_p3), 125  }
   0x7   : > { %211 = sbr.rel (%p208_p3) target bundleno = 592 (0x250), region = 40  ;;  %s767_s27 = smov (!%p208_p3), 127  }
   0x8   : > { %s768_s30 = smov (!%p208_p3), 124  }
   0xc   : > { %v765_v0 = vmov 0.0   ;;  %s972_s18 = smov (!%p245_p4, %s755_s18), 1  ;;  %v351_v13 = vld [vmem:[%s962_s1 + $0x8] sm:$0xff]  ;;  %vm382_vm0 = vcmask 130048   ;;  %v361_v14 = vld [vmem:[%s963_s2 + $0x18] sm:$0xff]  ;;  %v360_v15 = vld [vmem:[%s963_s2 + $0x10] sm:$0xff] }
   0xd   : > { %395 = vmatprep.subr.mxu0 %v765_v0  ;;  %s691_s22 = sshll.u32 %s972_s18, 7  ;;  %683 = vmatprep.mubr.msk.f32.mxu0 %vm382_vm0, %v351_v13  ;;  %v769_v16 = vmov 0   ;;  %v358_v17 = vld [vmem:[%s963_s2] sm:$0xff]  ;;  %v359_v18 = vld [vmem:[%s963_s2 + $0x8] sm:$0xff]  ;;  %vm316_vm1 = vcmask 1022976   ;;  %vm287_vm2 = vcmask 1039360  }
   0xe   : > { %s825_s25 = scalar_lea.vmem %s961_s0, %s691_s22  ;;  %739 = vset.pattern.permute.xlu0 %v769_v16  ;;  %740 = vset.pattern.permute.xlu1 %v769_v16  ;;  %v486_v19 = vld [vmem:[%s965_s4] sm:$0xff]  ;;  %v487_v20 = vld [vmem:[%s965_s4 + $0x8] sm:$0xff]  ;;  %vm345_vm3 = vcmask 1014784   ;;  %v353_v54 = vld [vmem:[%s962_s1 + $0x18] sm:$0xff]  ;;  %vm498_vm4 = vcmask 261120   ;;  %s692_s15 = sshll.u32 %s972_s18, 4 }
   0xf   : > { %v828_v1 = vld [vmem:[%s825_s25 + $0x30] sm:$0xff]  ;;  %v831_v2 = vld [vmem:[%s825_s25 + $0x20] sm:$0xff]  ;;  %v274_v3 = vld [vmem:[%s825_s25 + $0x38] sm:$0xff]  ;;  %s260_s22 = scalar_lea.vmem %s966_s5, %s692_s15 }
  0x10   : > { %329 = vrot.lane.b32.xlu0 %v828_v1, %s766_s26  ;;  %325 = vrot.lane.b32.xlu1 %v831_v2, %s766_s26  ;;  %v273_v4 = vld [vmem:[%s825_s25 + $0x28] sm:$0xff]  ;;  %v266_v5 = vld [vmem:[%s825_s25 + $0x18] sm:$0xff] }
  0x11   : > { %v839_v6 = vld [vmem:[%s825_s25 + $0x10] sm:$0xff]  ;;  %v265_v7 = vld [vmem:[%s825_s25 + $0x8] sm:$0xff]  ;;  %v844_v8 = vld [vmem:[%s825_s25] sm:$0xff] }
  0x12   : > { %v272_v9 = vld [vmem:[%s825_s25 + $0x58] sm:$0xff]  ;;  %v849_v10 = vld [vmem:[%s825_s25 + $0x50] sm:$0xff]  ;;  %v271_v11 = vld [vmem:[%s825_s25 + $0x48] sm:$0xff] }
  0x13   : > { %v854_v12 = vld [vmem:[%s825_s25 + $0x40] sm:$0xff]  ;;  %v270_v39 = vld [vmem:[%s825_s25 + $0x70] sm:$0xff]  ;;  %v355_v56 = vld [vmem:[%s962_s1 + $0x28] sm:$0xff] }
  0x14   : > { %331 = vrot.lane.b32.xlu0 %v274_v3, %s766_s26  ;;  %327 = vrot.lane.b32.xlu1 %v273_v4, %s766_s26  ;;  %v269_v40 = vld [vmem:[%s825_s25 + $0x60] sm:$0xff]  ;;  %v352_v55 = vld [vmem:[%s962_s1 + $0x10] sm:$0xff] }
  0x15   : > { %v350_v53 = vld [vmem:[%s962_s1] sm:$0xff]  ;;  %v357_v58 = vld [vmem:[%s962_s1 + $0x38] sm:$0xff]  ;;  %v356_v59 = vld [vmem:[%s962_s1 + $0x30] sm:$0xff] }
  0x16   : > { %v354_v57 = vld [vmem:[%s962_s1 + $0x20] sm:$0xff] }
  0x17   : > { %v484_v60 = vld [vmem:[%s964_s3] sm:$0xff] }
  0x18   : > { %314 = vrot.lane.b32.xlu1 %v266_v5, %s766_s26  ;;  %312 = vrot.lane.b32.xlu0 %v839_v6, %s766_s26 }
  0x19   : > { %707 = vmatprep.mubr.msk.f32.mxu1 %vm498_vm4, %v484_v60 }
  0x1c   : > { %310 = vrot.lane.b32.xlu1 %v265_v7, %s766_s26  ;;  %308 = vrot.lane.b32.xlu0 %v844_v8, %s766_s26 }
  0x20   : > { %302 = vrot.lane.b32.xlu1 %v272_v9, %s767_s27  ;;  %300 = vrot.lane.b32.xlu0 %v849_v10, %s767_s27 }
  0x24   : > { %298 = vrot.lane.b32.xlu1 %v271_v11, %s767_s27  ;;  %296 = vrot.lane.b32.xlu0 %v854_v12, %s767_s27 }
  0x28   : > { %285 = vrot.lane.b32.xlu1 %v266_v5, %s767_s27  ;;  %283 = vrot.lane.b32.xlu0 %v839_v6, %s767_s27 }
  0x2c   : > { %281 = vrot.lane.b32.xlu1 %v265_v7, %s767_s27  ;;  %279 = vrot.lane.b32.xlu0 %v844_v8, %s767_s27 }
  0x30   : > { %343 = vrot.lane.b32.xlu1 %v266_v5, %s768_s30  ;;  %341 = vrot.lane.b32.xlu0 %v839_v6, %s768_s30 }
  0x34   : > { %339 = vrot.lane.b32.xlu1 %v265_v7, %s768_s30  ;;  %337 = vrot.lane.b32.xlu0 %v844_v8, %s768_s30 }
  0x38   : > { %379 = vperm.xlu0 %739, %v361_v14   ;;  %374 = vperm.xlu1 %740, %v360_v15  }
  0x3c   : > { %364 = vperm.xlu0 %739, %v358_v17   ;;  %369 = vperm.xlu1 %740, %v359_v18   ;;  %v485_v17 = vld [vmem:[%s964_s3 + $0x8] sm:$0xff] }
  0x40   : > { %490 = vperm.xlu1 %740, %v486_v19   ;;  %495 = vperm.xlu0 %739, %v487_v20  }
  0x82   : > { %v330_v21 = vpop.permute.xlu0 %329  ;;  %v326_v22 = vpop.permute.xlu1 %325 }
  0x86   : > { %v332_v23 = vpop.permute.xlu0 %331  ;;  %v328_v24 = vpop.permute.xlu1 %327 }
  0x87   : > { %v334_v25 = vsel %vm316_vm1, %v330_v21, %v332_v23  ;;  %v333_v26 = vsel %vm316_vm1, %v326_v22, %v328_v24 }
  0x88   : > { %396 = vmatpush1.msra.mxu0 %v334_v25 }
  0x89   : > { %397 = vmatprep.subr.mxu0 %v765_v0 }
  0x8a   : > { %398 = vmatpush1.msra.mxu0 %v333_v26  ;;  %v315_v27 = vpop.permute.xlu1 %314  ;;  %v313_v28 = vpop.permute.xlu0 %312 }
  0x8b   : > { %399 = vmatprep.subr.mxu0 %v765_v0  ;;  %v318_v29 = vsel %vm316_vm1, %v313_v28, %v315_v27 }
  0x8c   : > { %400 = vmatpush1.msra.mxu0 %v318_v29 }
  0x8d   : > { %401 = vmatprep.subr.mxu0 %v765_v0 }
  0x8e   : > { %v311_v30 = vpop.permute.xlu1 %310  ;;  %v309_v31 = vpop.permute.xlu0 %308 }
  0x8f   : > { %v317_v32 = vsel %vm316_vm1, %v309_v31, %v311_v30 }
  0x90   : > { %402 = vmatpush1.msra.mxu0 %v317_v32 }
  0x91   : > { %403 = vmatprep.subr.mxu0 %v765_v0 }
  0x92   : > { %v303_v33 = vpop.permute.xlu1 %302  ;;  %v301_v34 = vpop.permute.xlu0 %300 }
  0x93   : > { %v305_v35 = vsel %vm287_vm2, %v301_v34, %v303_v33 }
  0x94   : > { %404 = vmatpush1.msra.mxu0 %v305_v35 }
  0x95   : > { %405 = vmatprep.subr.mxu0 %v765_v0 }
  0x96   : > { %v299_v36 = vpop.permute.xlu1 %298  ;;  %v297_v37 = vpop.permute.xlu0 %296 }
  0x97   : > { %v304_v38 = vsel %vm287_vm2, %v297_v37, %v299_v36 }
  0x98   : > { %406 = vmatpush1.msra.mxu0 %v304_v38 }
  0x99   : > { %407 = vmatprep.subr.mxu0 %v765_v0 }
  0x9a   : > { %408 = vmatpush1.msra.mxu0 %v270_v39  ;;  %v286_v41 = vpop.permute.xlu1 %285  ;;  %v284_v42 = vpop.permute.xlu0 %283 }
  0x9b   : > { %409 = vmatprep.subr.mxu0 %v765_v0  ;;  %v289_v45 = vsel %vm287_vm2, %v284_v42, %v286_v41 }
  0x9c   : > { %410 = vmatpush1.msra.mxu0 %v269_v40 }
  0x9d   : > { %411 = vmatprep.subr.mxu0 %v765_v0 }
  0x9e   : > { %412 = vmatpush1.msra.mxu0 %v849_v10  ;;  %v282_v43 = vpop.permute.xlu1 %281  ;;  %v280_v44 = vpop.permute.xlu0 %279 }
  0x9f   : > { %413 = vmatprep.subr.mxu0 %v765_v0  ;;  %v288_v46 = vsel %vm287_vm2, %v280_v44, %v282_v43 }
  0xa0   : > { %414 = vmatpush1.msra.mxu0 %v854_v12 }
  0xa1   : > { %415 = vmatprep.subr.mxu0 %v765_v0 }
  0xa2   : > { %416 = vmatpush1.msra.mxu0 %v289_v45  ;;  %v344_v47 = vpop.permute.xlu1 %343  ;;  %v342_v48 = vpop.permute.xlu0 %341 }
  0xa3   : > { %417 = vmatprep.subr.mxu0 %v765_v0  ;;  %v347_v51 = vsel %vm345_vm3, %v342_v48, %v344_v47 }
  0xa4   : > { %418 = vmatpush1.msra.mxu0 %v288_v46 }
  0xa5   : > { %419 = vmatprep.subr.mxu0 %v765_v0 }
  0xa6   : > { %420 = vmatpush1.msra.mxu0 %v828_v1  ;;  %v340_v49 = vpop.permute.xlu1 %339  ;;  %v338_v50 = vpop.permute.xlu0 %337 }
  0xa7   : > { %421 = vmatprep.subr.mxu0 %v765_v0  ;;  %v346_v52 = vsel %vm345_vm3, %v338_v50, %v340_v49 }
  0xa8   : > { %422 = vmatpush1.msra.mxu0 %v831_v2 }
  0xa9   : > { %423 = vmatprep.subr.mxu0 %v765_v0 }
  0xaa   : > { %424 = vmatpush1.msra.mxu0 %v839_v6 }
  0xab   : > { %425 = vmatprep.subr.mxu0 %v765_v0 }
  0xac   : > { %426 = vmatpush1.msra.mxu0 %v844_v8 }
  0xad   : > { %455 = vmatprep.subr.mxu0 %v765_v0 }
  0xae   : > { %456 = vmatpush2.msra.mxu0 %v347_v51 }
  0xaf   : > { %457 = vmatprep.subr.mxu0 %v765_v0 }
  0xb0   : > { %458 = vmatpush2.msra.mxu0 %v346_v52 }
  0xb1   : > { %460 = vmatmul.mubr.f32.vlgmr.msra.gmra.mxu0 %v350_v53 }
  0xb2   : > { %684 = vmatprep.mubr.msk.f32.mxu0 %vm382_vm0, %v353_v54 }
  0xb3   : > { %v375_v0 = vpop.permute.xlu1 %374  ;;  %v380_v2 = vpop.permute.xlu0 %379 }
  0xb5   : > { %465 = vmatmul.mubr.f32.gmra.mxu0 %v352_v55 }
  0xb6   : > { %685 = vmatprep.mubr.msk.f32.mxu0 %vm382_vm0, %v355_v56 }
  0xb7   : > { %v370_v5 = vpop.permute.xlu1 %369  ;;  %v365_v9 = vpop.permute.xlu0 %364 }
  0xb9   : > { %470 = vmatmul.mubr.f32.gmra.mxu0 %v354_v57 }
  0xba   : > { %686 = vmatprep.mubr.msk.f32.mxu0 %vm382_vm0, %v357_v58 }
  0xbb   : > { %v496_v18 = vpop.permute.xlu0 %495  ;;  %v491_v21 = vpop.permute.xlu1 %490 }
  0xbd   : > { %475 = vmatmul.mubr.f32.gmra.mxu0 %v356_v59 }
 0x171   : > { %v461_v61 = vpop.f32.mrf.mxu0 }
 0x172   : > { %v462_v13 = vadd.f32 %v461_v61, %v365_v9 }
 0x173   : > { %v463_v62 = vpop.f32.mrf.mxu0 }
 0x174   : > { %v480_v16 = vmax.f32 %v462_v13, 0.0 }
 0x175   : > { %v466_v63 = vpop.f32.mrf.mxu0 }
 0x176   : > { %v467_v11 = vadd.f32 %v466_v63, %v370_v5 }
 0x177   : > { %v468_v1 = vpop.f32.mrf.mxu0 }
 0x178   : > { %v481_v15 = vmax.f32 %v467_v11, 0.0 }
 0x179   : > { %v471_v3 = vpop.f32.mrf.mxu0 }
 0x17a   : > { %v472_v7 = vadd.f32 %v471_v3, %v375_v0 }
 0x17b   : > { %v473_v4 = vpop.f32.mrf.mxu0 }
 0x17c   : > { %v482_v14 = vmax.f32 %v472_v7, 0.0 }
 0x17d   : > { %v476_v6 = vpop.f32.mrf.mxu0 }
 0x17e   : > { %v477_v8 = vadd.f32 %v476_v6, %v380_v2 }
 0x17f   : > { %v478_v10 = vpop.f32.mrf.mxu0 }
 0x180   : > { %v483_v12 = vmax.f32 %v477_v8, 0.0 }
 0x182   : > { %699 = vmatprep.subr.mxu1 %v483_v12 }
 0x183   : > { %700 = vmatpush3.msra.mxu1 %v483_v12 }
 0x184   : > { %701 = vmatprep.subr.mxu1 %v482_v14 }
 0x185   : > { %702 = vmatpush3.msra.mxu1 %v482_v14 }
 0x186   : > { %703 = vmatprep.subr.mxu1 %v481_v15 }
 0x187   : > { %704 = vmatpush3.msra.mxu1 %v481_v15 }
 0x188   : > { %705 = vmatprep.subr.mxu1 %v480_v16 }
 0x189   : > { %706 = vmatpush3.msra.mxu1 %v480_v16 }
 0x18a   : > { %708 = vmatmul.mubr.msk.f32.vlgmr.msra.gmra.mxu1 %vm498_vm4, %v485_v17 }
 0x24a   : > { %v709_v19 = vpop.f32.mrf.mxu1 }
 0x24b   : > { %v577_v20 = vadd.f32 %v709_v19, %v496_v18 }
 0x24c   : > { %v571_v22 = vpop.f32.mrf.mxu1 }
 0x24d   : > { %581 = vst [vmem:[%s260_s22 + $0x8] sm:$0xff] %v577_v20  ;;  %v572_v23 = vadd.f32 %v571_v22, %v491_v21 }
 0x24f   : > { %580 = vst [vmem:[%s260_s22] sm:$0xff] %v572_v23 }
 0x250 PF: > { %s15_s20 = sadd.s32 1, %s763_s20   ;;  %s967_s18 = smov %s759_s19 }
 0x251   : > { %p12_p5 = scmp.ge.s32.totalorder %s15_s20, 4   ;;  %s968_s19 = smov %s970_s21 }
 0x253   :  { %14 = sbr.rel (!%p12_p5) target bundleno = 2 (0x2), region = 70 }

// kernel: one_stage_detector_forward.8
= control target key start
LH: loop header
LB: loop body
LE: loop exit
PB: predicated region body
PF: predicated region fallthrough
CT: control target
= control target key end

     0   :  { %s757_s12 = smov 0   ;;  %s759_s13 = smov 0   ;;  %s894_s0 = inlined_call_operand.vmem [shape: f32[3,2,16,150], index: 0, kind: input, shape index: {}]   ;;  %s895_s1 = inlined_call_operand.vmem [shape: f32[3,16,144], index: 1, kind: input, shape index: {}]   ;;  %s896_s2 = inlined_call_operand.vmem [shape: f32[3,16,1], index: 2, kind: input, shape index: {}]   ;;  %s897_s3 = inlined_call_operand.vmem [shape: f32[3,2,16,128], index: 3, kind: output, shape index: {}]  }
   0x1   :  { %s761_s14 = smov 0   ;;  %s763_s15 = smov 0  }
   0x2   :  { %s765_s16 = smov 0  }
   0x3 LB: > { %s22_s17 = sadd.s32 1, %s717_s14  ;;  %s25_s18 = sadd.s32 1, %s721_s15  ;;  %s725_s16 = sphi %s765_s16, %s13_s16   ;;  %s721_s15 = sphi %s763_s15, %s901_s15   ;;  %s717_s14 = sphi %s761_s14, %s900_s14   ;;  %s713_s13 = sphi %s759_s13, %s899_s13   ;;  %s709_s12 = sphi %s757_s12, %s898_s12  }
   0x4   : > { %p23_p0 = scmp.ge.s32.totalorder %s22_s17, 2  ;;  %p582_p1 = scmp.ge.s32.totalorder %s725_s16, 1 }
   0x5   : > { %p177_p2 = scmp.lt.s32.totalorder %s725_s16, 7 }
   0x6   : > { %s903_s17 = smov (%p23_p0, %s22_s17), 0  ;;  %s905_s18 = smov (!%p23_p0, %s25_s18), %s721_s15 }
   0x7   : > { %p178_p3 = pnand %p582_p1, %p177_p2  ;;  %p27_p4 = scmp.ge.s32.totalorder %s905_s18, 3 }
   0x8   : > { %p219_p5 = scmp.lt.s32.totalorder (!%p178_p3), %s713_s13, 2  ;;  %p221_p6 = scmp.lt.s32.totalorder (!%p178_p3), %s709_s12, 1 }
   0x9   : > { %s907_s18 = smov (%p27_p4, %s905_s18), 0  ;;  %181 = sbr.rel (%p178_p3) target bundleno = 393 (0x189), region = 32 }
   0xa   : > { %s728_s26 = smov (!%p178_p3), 107   ;;  %s729_s27 = smov (!%p178_p3), 108  }
   0xb   : > { %s730_s28 = smov (!%p178_p3), 116   ;;  %s731_s29 = smov (!%p178_p3), 117  }
   0xc   : > { %s732_s30 = smov (!%p178_p3), 118   ;;  %s733_s4 = smov (!%p178_p3), 126  }
   0xd   : > { %s734_s9 = smov (!%p178_p3), 127   ;;  %s736_s11 = smov (!%p178_p3), 106  }
   0xe   : > { %v727_v0 = vmov 0.0   ;;  %s909_s13 = smov (!%p219_p5, %s713_s13), 2  ;;  %s911_s12 = smov (!%p221_p6, %s709_s12), 1  ;;  %vm375_vm0 = vcmask 130048   ;;  %v735_v7 = vmov 0   ;;  %vm341_vm1 = vcmask 875520  }
   0xf   : > { %382 = vmatprep.subr.mxu0 %v727_v0  ;;  %599 = vmatprep.subr.mxu1 %v727_v0  ;;  %s584_s19 = sshll.u32 %s909_s13, 3  ;;  %s583_s20 = sshll.u32 %s911_s12, 2  ;;  %vm328_vm2 = vcmask 883712   ;;  %vm315_vm3 = vcmask 949248   ;;  %vm302_vm4 = vcmask 957440   ;;  %vm289_vm5 = vcmask 965632  }
  0x10   : > { %s225_s21 = sadd.s32 %s584_s19, %s583_s20  ;;  %s597_s5 = sshll.u32 %s909_s13, 5  ;;  %686 = vset.pattern.permute.xlu1 %v735_v7  ;;  %685 = vset.pattern.permute.xlu0 %v735_v7  ;;  %vm276_vm6 = vcmask 1031168   ;;  %vm263_vm7 = vcmask 1039360   ;;  %vm354_vm8 = vcmask 867328  }
  0x11   : > { %s585_s22 = sshll.u32 %s225_s21, 3  ;;  %s818_s8 = scalar_lea.vmem %s895_s1, %s597_s5 }
  0x12   : > { %s227_s25 = scalar_lea.vmem %s894_s0, %s585_s22  ;;  %v360_v5 = vld [vmem:[%s818_s8 + $0x8] sm:$0xff]  ;;  %v362_v6 = vld [vmem:[%s818_s8 + $0x18] sm:$0xff]  ;;  %s598_s10 = sshll.u32 %s909_s13, 4  ;;  %v359_v57 = vld [vmem:[%s818_s8] sm:$0xff] }
  0x13   : > { %v798_v1 = vld [vmem:[%s227_s25 + $0x10] sm:$0xff]  ;;  %v800_v2 = vld [vmem:[%s227_s25] sm:$0xff]  ;;  %v250_v3 = vld [vmem:[%s227_s25 + $0x18] sm:$0xff]  ;;  %593 = vmatprep.mubr.msk.f32.mxu0 %vm375_vm0, %v360_v5  ;;  %594 = vmatprep.mubr.msk.f32.mxu1 %vm375_vm0, %v362_v6  ;;  %s237_s21 = scalar_lea.vmem %s896_s2, %s598_s10  ;;  %s590_s22 = sshll.u32 %s911_s12, 1 }
  0x14   : > { %337 = vrot.lane.b32.xlu0 %v798_v1, %s728_s26  ;;  %333 = vrot.lane.b32.xlu1 %v800_v2, %s728_s26  ;;  %v249_v4 = vld [vmem:[%s227_s25 + $0x8] sm:$0xff]  ;;  %v363_v8 = vld [vmem:[%s237_s21] sm:$0xff]  ;;  %s591_s23 = sshll.u32 %s909_s13, 2 }
  0x15   : > { %v364_v9 = vld [vmem:[%s237_s21 + $0x8] sm:$0xff]  ;;  %v361_v58 = vld [vmem:[%s818_s8 + $0x10] sm:$0xff]  ;;  %s244_s24 = sadd.s32 %s591_s23, %s590_s22 }
  0x16   : > { %s592_s25 = sshll.u32 %s244_s24, 3 }
  0x18   : > { %339 = vrot.lane.b32.xlu0 %v250_v3, %s728_s26  ;;  %335 = vrot.lane.b32.xlu1 %v249_v4, %s728_s26 }
  0x1c   : > { %324 = vrot.lane.b32.xlu0 %v798_v1, %s729_s27  ;;  %326 = vrot.lane.b32.xlu1 %v250_v3, %s729_s27 }
  0x20   : > { %320 = vrot.lane.b32.xlu0 %v800_v2, %s729_s27  ;;  %322 = vrot.lane.b32.xlu1 %v249_v4, %s729_s27 }
  0x24   : > { %311 = vrot.lane.b32.xlu0 %v798_v1, %s730_s28  ;;  %313 = vrot.lane.b32.xlu1 %v250_v3, %s730_s28 }
  0x28   : > { %307 = vrot.lane.b32.xlu0 %v800_v2, %s730_s28  ;;  %309 = vrot.lane.b32.xlu1 %v249_v4, %s730_s28  ;;  %s246_s28 = scalar_lea.vmem %s897_s3, %s592_s25 }
  0x2c   : > { %298 = vrot.lane.b32.xlu0 %v798_v1, %s731_s29  ;;  %300 = vrot.lane.b32.xlu1 %v250_v3, %s731_s29 }
  0x30   : > { %294 = vrot.lane.b32.xlu0 %v800_v2, %s731_s29  ;;  %296 = vrot.lane.b32.xlu1 %v249_v4, %s731_s29 }
  0x34   : > { %285 = vrot.lane.b32.xlu0 %v798_v1, %s732_s30  ;;  %287 = vrot.lane.b32.xlu1 %v250_v3, %s732_s30 }
  0x38   : > { %281 = vrot.lane.b32.xlu0 %v800_v2, %s732_s30  ;;  %283 = vrot.lane.b32.xlu1 %v249_v4, %s732_s30 }
  0x3c   : > { %272 = vrot.lane.b32.xlu0 %v798_v1, %s733_s4  ;;  %274 = vrot.lane.b32.xlu1 %v250_v3, %s733_s4 }
  0x40   : > { %268 = vrot.lane.b32.xlu0 %v800_v2, %s733_s4  ;;  %270 = vrot.lane.b32.xlu1 %v249_v4, %s733_s4 }
  0x44   : > { %259 = vrot.lane.b32.xlu0 %v798_v1, %s734_s9  ;;  %261 = vrot.lane.b32.xlu1 %v250_v3, %s734_s9 }
  0x48   : > { %255 = vrot.lane.b32.xlu0 %v800_v2, %s734_s9  ;;  %257 = vrot.lane.b32.xlu1 %v249_v4, %s734_s9 }
  0x4c   : > { %350 = vrot.lane.b32.xlu0 %v798_v1, %s736_s11  ;;  %352 = vrot.lane.b32.xlu1 %v250_v3, %s736_s11 }
  0x50   : > { %346 = vrot.lane.b32.xlu0 %v800_v2, %s736_s11  ;;  %348 = vrot.lane.b32.xlu1 %v249_v4, %s736_s11 }
  0x54   : > { %367 = vperm.xlu0 %685, %v363_v8   ;;  %372 = vperm.xlu1 %686, %v364_v9  }
  0x86   : > { %v338_v10 = vpop.permute.xlu0 %337  ;;  %v334_v11 = vpop.permute.xlu1 %333 }
  0x8a   : > { %v340_v12 = vpop.permute.xlu0 %339  ;;  %v336_v13 = vpop.permute.xlu1 %335 }
  0x8b   : > { %v343_v14 = vsel %vm341_vm1, %v338_v10, %v340_v12  ;;  %v342_v15 = vsel %vm341_vm1, %v334_v11, %v336_v13 }
  0x8c   : > { %383 = vmatpush1.msra.mxu0 %v343_v14  ;;  %617 = vmatpush1.msra.mxu1 %v343_v14 }
  0x8d   : > { %384 = vmatprep.subr.mxu0 %v727_v0  ;;  %600 = vmatprep.subr.mxu1 %v727_v0 }
  0x8e   : > { %v325_v16 = vpop.permute.xlu0 %324  ;;  %385 = vmatpush1.msra.mxu0 %v342_v15  ;;  %618 = vmatpush1.msra.mxu1 %v342_v15  ;;  %v327_v17 = vpop.permute.xlu1 %326 }
  0x8f   : > { %386 = vmatprep.subr.mxu0 %v727_v0  ;;  %601 = vmatprep.subr.mxu1 %v727_v0  ;;  %v330_v18 = vsel %vm328_vm2, %v325_v16, %v327_v17 }
  0x90   : > { %387 = vmatpush1.msra.mxu0 %v330_v18  ;;  %619 = vmatpush1.msra.mxu1 %v330_v18 }
  0x91   : > { %388 = vmatprep.subr.mxu0 %v727_v0  ;;  %602 = vmatprep.subr.mxu1 %v727_v0 }
  0x92   : > { %v321_v19 = vpop.permute.xlu0 %320  ;;  %v323_v20 = vpop.permute.xlu1 %322 }
  0x93   : > { %v329_v21 = vsel %vm328_vm2, %v321_v19, %v323_v20 }
  0x94   : > { %389 = vmatpush1.msra.mxu0 %v329_v21  ;;  %620 = vmatpush1.msra.mxu1 %v329_v21 }
  0x95   : > { %390 = vmatprep.subr.mxu0 %v727_v0  ;;  %603 = vmatprep.subr.mxu1 %v727_v0 }
  0x96   : > { %v312_v22 = vpop.permute.xlu0 %311  ;;  %v314_v23 = vpop.permute.xlu1 %313 }
  0x97   : > { %v317_v24 = vsel %vm315_vm3, %v312_v22, %v314_v23 }
  0x98   : > { %391 = vmatpush1.msra.mxu0 %v317_v24  ;;  %621 = vmatpush1.msra.mxu1 %v317_v24 }
  0x99   : > { %392 = vmatprep.subr.mxu0 %v727_v0  ;;  %604 = vmatprep.subr.mxu1 %v727_v0 }
  0x9a   : > { %v308_v25 = vpop.permute.xlu0 %307  ;;  %v310_v26 = vpop.permute.xlu1 %309 }
  0x9b   : > { %v316_v27 = vsel %vm315_vm3, %v308_v25, %v310_v26 }
  0x9c   : > { %393 = vmatpush1.msra.mxu0 %v316_v27  ;;  %622 = vmatpush1.msra.mxu1 %v316_v27 }
  0x9d   : > { %394 = vmatprep.subr.mxu0 %v727_v0  ;;  %605 = vmatprep.subr.mxu1 %v727_v0 }
  0x9e   : > { %v299_v28 = vpop.permute.xlu0 %298  ;;  %v301_v29 = vpop.permute.xlu1 %300 }
  0x9f   : > { %v304_v30 = vsel %vm302_vm4, %v299_v28, %v301_v29 }
  0xa0   : > { %395 = vmatpush1.msra.mxu0 %v304_v30  ;;  %623 = vmatpush1.msra.mxu1 %v304_v30 }
  0xa1   : > { %396 = vmatprep.subr.mxu0 %v727_v0  ;;  %606 = vmatprep.subr.mxu1 %v727_v0 }
  0xa2   : > { %v295_v31 = vpop.permute.xlu0 %294  ;;  %v297_v32 = vpop.permute.xlu1 %296 }
  0xa3   : > { %v303_v33 = vsel %vm302_vm4, %v295_v31, %v297_v32 }
  0xa4   : > { %397 = vmatpush1.msra.mxu0 %v303_v33  ;;  %624 = vmatpush1.msra.mxu1 %v303_v33 }
  0xa5   : > { %398 = vmatprep.subr.mxu0 %v727_v0  ;;  %607 = vmatprep.subr.mxu1 %v727_v0 }
  0xa6   : > { %v286_v34 = vpop.permute.xlu0 %285  ;;  %v288_v35 = vpop.permute.xlu1 %287 }
  0xa7   : > { %v291_v36 = vsel %vm289_vm5, %v286_v34, %v288_v35 }
  0xa8   : > { %399 = vmatpush1.msra.mxu0 %v291_v36  ;;  %625 = vmatpush1.msra.mxu1 %v291_v36 }
  0xa9   : > { %400 = vmatprep.subr.mxu0 %v727_v0  ;;  %608 = vmatprep.subr.mxu1 %v727_v0 }
  0xaa   : > { %v282_v37 = vpop.permute.xlu0 %281  ;;  %v284_v38 = vpop.permute.xlu1 %283 }
  0xab   : > { %v290_v39 = vsel %vm289_vm5, %v282_v37, %v284_v38 }
  0xac   : > { %401 = vmatpush1.msra.mxu0 %v290_v39  ;;  %626 = vmatpush1.msra.mxu1 %v290_v39 }
  0xad   : > { %402 = vmatprep.subr.mxu0 %v727_v0  ;;  %609 = vmatprep.subr.mxu1 %v727_v0 }
  0xae   : > { %v273_v40 = vpop.permute.xlu0 %272  ;;  %v275_v41 = vpop.permute.xlu1 %274 }
  0xaf   : > { %v278_v42 = vsel %vm276_vm6, %v273_v40, %v275_v41 }
  0xb0   : > { %403 = vmatpush1.msra.mxu0 %v278_v42  ;;  %627 = vmatpush1.msra.mxu1 %v278_v42 }
  0xb1   : > { %404 = vmatprep.subr.mxu0 %v727_v0  ;;  %610 = vmatprep.subr.mxu1 %v727_v0 }
  0xb2   : > { %v269_v43 = vpop.permute.xlu0 %268  ;;  %v271_v44 = vpop.permute.xlu1 %270 }
  0xb3   : > { %v277_v45 = vsel %vm276_vm6, %v269_v43, %v271_v44 }
  0xb4   : > { %405 = vmatpush1.msra.mxu0 %v277_v45  ;;  %628 = vmatpush1.msra.mxu1 %v277_v45 }
  0xb5   : > { %406 = vmatprep.subr.mxu0 %v727_v0  ;;  %611 = vmatprep.subr.mxu1 %v727_v0 }
  0xb6   : > { %v260_v46 = vpop.permute.xlu0 %259  ;;  %v262_v47 = vpop.permute.xlu1 %261 }
  0xb7   : > { %v265_v48 = vsel %vm263_vm7, %v260_v46, %v262_v47 }
  0xb8   : > { %407 = vmatpush1.msra.mxu0 %v265_v48  ;;  %629 = vmatpush1.msra.mxu1 %v265_v48 }
  0xb9   : > { %408 = vmatprep.subr.mxu0 %v727_v0  ;;  %612 = vmatprep.subr.mxu1 %v727_v0 }
  0xba   : > { %v256_v49 = vpop.permute.xlu0 %255  ;;  %v258_v50 = vpop.permute.xlu1 %257 }
  0xbb   : > { %v264_v51 = vsel %vm263_vm7, %v256_v49, %v258_v50 }
  0xbc   : > { %409 = vmatpush1.msra.mxu0 %v264_v51  ;;  %630 = vmatpush1.msra.mxu1 %v264_v51 }
  0xbd   : > { %410 = vmatprep.subr.mxu0 %v727_v0  ;;  %613 = vmatprep.subr.mxu1 %v727_v0 }
  0xbe   : > { %v351_v52 = vpop.permute.xlu0 %350  ;;  %411 = vmatpush1.msra.mxu0 %v798_v1  ;;  %631 = vmatpush1.msra.mxu1 %v798_v1  ;;  %v353_v53 = vpop.permute.xlu1 %352 }
  0xbf   : > { %412 = vmatprep.subr.mxu0 %v727_v0  ;;  %614 = vmatprep.subr.mxu1 %v727_v0  ;;  %v356_v54 = vsel %vm354_vm8, %v351_v52, %v353_v53 }
  0xc0   : > { %413 = vmatpush1.msra.mxu0 %v800_v2  ;;  %632 = vmatpush1.msra.mxu1 %v800_v2 }
  0xc1   : > { %442 = vmatprep.subr.mxu0 %v727_v0  ;;  %615 = vmatprep.subr.mxu1 %v727_v0 }
  0xc2   : > { %v347_v55 = vpop.permute.xlu0 %346  ;;  %443 = vmatpush2.msra.mxu0 %v356_v54  ;;  %633 = vmatpush2.msra.mxu1 %v356_v54  ;;  %v349_v56 = vpop.permute.xlu1 %348 }
  0xc3   : > { %444 = vmatprep.subr.mxu0 %v727_v0  ;;  %616 = vmatprep.subr.mxu1 %v727_v0  ;;  %v355_v59 = vsel %vm354_vm8, %v347_v55, %v349_v56 }
  0xc4   : > { %445 = vmatpush2.msra.mxu0 %v355_v59  ;;  %634 = vmatpush2.msra.mxu1 %v355_v59 }
  0xc5   : > { %447 = vmatmul.mubr.f32.vlgmr.msra.gmra.mxu0 %v359_v57  ;;  %452 = vmatmul.mubr.f32.vlgmr.msra.gmra.mxu1 %v361_v58 }
  0xcf   : > { %v368_v60 = vpop.permute.xlu0 %367  ;;  %v373_v61 = vpop.permute.xlu1 %372 }
 0x185   : > { %v448_v62 = vpop.f32.mrf.mxu0  ;;  %v453_v63 = vpop.f32.mrf.mxu1 }
 0x186   : > { %v449_v1 = vadd.f32 %v448_v62, %v368_v60  ;;  %v454_v0 = vadd.f32 %v453_v63, %v373_v61 }
 0x187   : > { %v450_v2 = vpop.f32.mrf.mxu0  ;;  %v455_v3 = vpop.f32.mrf.mxu1 }
 0x188   : > { %457 = vst [vmem:[%s246_s28] sm:$0xff] %v449_v1  ;;  %458 = vst [vmem:[%s246_s28 + $0x8] sm:$0xff] %v454_v0 }
 0x189 PF: > { %s13_s16 = sadd.s32 1, %s725_s16   ;;  %s898_s12 = smov %s717_s14 }
 0x18a   : > { %p10_p7 = scmp.ge.s32.totalorder %s13_s16, 8   ;;  %s899_s13 = smov %s721_s15 }
 0x18b   : > { %s900_s14 = smov %s903_s17  ;;  %s901_s15 = smov %s907_s18 }
 0x18c   :  { %12 = sbr.rel (!%p10_p7) target bundleno = 3 (0x3), region = 68 }

// kernel: one_stage_detector_forward.9
= control target key start
LH: loop header
LB: loop body
LE: loop exit
PB: predicated region body
PF: predicated region fallthrough
CT: control target
= control target key end

     0   :  { %s893_s18 = smov 0   ;;  %s895_s19 = smov 0   ;;  %s1059_s0 = inlined_call_operand.vmem [shape: f32[3,2,16,150], index: 0, kind: input, shape index: {}]   ;;  %s1060_s1 = inlined_call_operand.vmem [shape: f32[1,16,144], index: 1, kind: input, shape index: {}]   ;;  %s1061_s2 = inlined_call_operand.vmem [shape: f32[1,16,1], index: 2, kind: input, shape index: {}]   ;;  %s1062_s3 = inlined_call_operand.vmem [shape: f32[36,16], index: 3, kind: input, shape index: {}]   ;;  %s1063_s4 = inlined_call_operand.vmem [shape: f32[36,1], index: 4, kind: input, shape index: {}]   ;;  %s1064_s5 = inlined_call_operand.vmem [shape: f32[3,2,36,128], index: 5, kind: output, shape index: {}]  }
   0x1   :  { %s897_s20 = smov 0   ;;  %s899_s21 = smov 0  }
   0x2   :  { %s901_s22 = smov 0  }
   0x3 LB: > { %s24_s23 = sadd.s32 1, %s842_s20  ;;  %s27_s24 = sadd.s32 1, %s846_s21  ;;  %s850_s22 = sphi %s901_s22, %s15_s22   ;;  %s846_s21 = sphi %s899_s21, %s1068_s21   ;;  %s842_s20 = sphi %s897_s20, %s1067_s20   ;;  %s838_s19 = sphi %s895_s19, %s1066_s19   ;;  %s834_s18 = sphi %s893_s18, %s1065_s18  }
   0x4   : > { %p25_p0 = scmp.ge.s32.totalorder %s24_s23, 2  ;;  %p717_p1 = scmp.ge.s32.totalorder %s850_s22, 1 }
   0x5   : > { %p207_p2 = scmp.lt.s32.totalorder %s850_s22, 7 }
   0x6   : > { %s1070_s23 = smov (%p25_p0, %s24_s23), 0  ;;  %s1072_s24 = smov (!%p25_p0, %s27_s24), %s846_s21 }
   0x7   : > { %p208_p3 = pnand %p717_p1, %p207_p2  ;;  %p29_p4 = scmp.ge.s32.totalorder %s1072_s24, 3 }
   0x8   : > { %p243_p5 = scmp.lt.s32.totalorder (!%p208_p3), %s838_s19, 2  ;;  %p245_p6 = scmp.lt.s32.totalorder (!%p208_p3), %s834_s18, 1 }
   0x9   : > { %s1074_s24 = smov (%p29_p4, %s1072_s24), 0  ;;  %211 = sbr.rel (%p208_p3) target bundleno = 613 (0x265), region = 40 }
   0xa   : > { %s853_s7 = smov (!%p208_p3), 107   ;;  %s854_s8 = smov (!%p208_p3), 108  }
   0xb   : > { %s855_s9 = smov (!%p208_p3), 116   ;;  %s856_s10 = smov (!%p208_p3), 117  }
   0xc   : > { %s857_s11 = smov (!%p208_p3), 118   ;;  %s858_s12 = smov (!%p208_p3), 126  }
   0xd   : > { %s859_s15 = smov (!%p208_p3), 127   ;;  %s861_s16 = smov (!%p208_p3), 106  }
   0xe   : > { %v852_v0 = vmov 0.0   ;;  %s1076_s19 = smov (!%p243_p5, %s838_s19), 2  ;;  %s1078_s18 = smov (!%p245_p6, %s834_s18), 1  ;;  %v374_v5 = vld [vmem:[%s1060_s1 + $0x8] sm:$0xff]  ;;  %vm389_vm0 = vcmask 130048   ;;  %v860_v6 = vmov 0  }
   0xf   : > { %396 = vmatprep.subr.mxu0 %v852_v0  ;;  %738 = vmatprep.subr.mxu1 %v852_v0  ;;  %s719_s25 = sshll.u32 %s1076_s19, 3  ;;  %s718_s26 = sshll.u32 %s1078_s18, 2  ;;  %v377_v7 = vld [vmem:[%s1061_s2] sm:$0xff]  ;;  %v378_v8 = vld [vmem:[%s1061_s2 + $0x8] sm:$0xff]  ;;  %v480_v11 = vld [vmem:[%s1063_s4 + $0x10] sm:$0xff]  ;;  %vm355_vm1 = vcmask 875520  }
  0x10   : > { %s249_s27 = sadd.s32 %s719_s25, %s718_s26  ;;  %722 = vmatprep.mubr.msk.f32.mxu0 %vm389_vm0, %v374_v5  ;;  %811 = vset.pattern.permute.xlu1 %v860_v6  ;;  %v478_v9 = vld [vmem:[%s1063_s4] sm:$0xff]  ;;  %v479_v10 = vld [vmem:[%s1063_s4 + $0x8] sm:$0xff]  ;;  %v481_v12 = vld [vmem:[%s1063_s4 + $0x18] sm:$0xff]  ;;  %vm342_vm2 = vcmask 883712   ;;  %vm329_vm3 = vcmask 949248   ;;  %vm316_vm4 = vcmask 957440  }
  0x11   : > { %s720_s28 = sshll.u32 %s249_s27, 3  ;;  %810 = vset.pattern.permute.xlu0 %v860_v6  ;;  %v482_v13 = vld [vmem:[%s1063_s4 + $0x20] sm:$0xf]  ;;  %vm303_vm5 = vcmask 965632   ;;  %vm290_vm6 = vcmask 1031168   ;;  %vm277_vm7 = vcmask 1039360  }
  0x12   : > { %s251_s6 = scalar_lea.vmem %s1059_s0, %s720_s28  ;;  %vm368_vm8 = vcmask 867328   ;;  %v373_v61 = vld [vmem:[%s1060_s1] sm:$0xff]  ;;  %v376_v63 = vld [vmem:[%s1060_s1 + $0x18] sm:$0xff]  ;;  %vm862_vm9 = vmmov 0  }
  0x13   : > { %v934_v1 = vld [vmem:[%s251_s6 + $0x10] sm:$0xff]  ;;  %v936_v2 = vld [vmem:[%s251_s6] sm:$0xff]  ;;  %v264_v3 = vld [vmem:[%s251_s6 + $0x18] sm:$0xff]  ;;  %742 = vmatprep.mubr.msk.f32.mxu1 %vm862_vm9, %v852_v0 }
  0x14   : > { %351 = vrot.lane.b32.xlu0 %v934_v1, %s853_s7  ;;  %347 = vrot.lane.b32.xlu1 %v936_v2, %s853_s7  ;;  %v263_v4 = vld [vmem:[%s251_s6 + $0x8] sm:$0xff] }
  0x18   : > { %353 = vrot.lane.b32.xlu0 %v264_v3, %s853_s7  ;;  %349 = vrot.lane.b32.xlu1 %v263_v4, %s853_s7 }
  0x1c   : > { %338 = vrot.lane.b32.xlu0 %v934_v1, %s854_s8  ;;  %340 = vrot.lane.b32.xlu1 %v264_v3, %s854_s8 }
  0x20   : > { %334 = vrot.lane.b32.xlu0 %v936_v2, %s854_s8  ;;  %336 = vrot.lane.b32.xlu1 %v263_v4, %s854_s8 }
  0x24   : > { %325 = vrot.lane.b32.xlu0 %v934_v1, %s855_s9  ;;  %327 = vrot.lane.b32.xlu1 %v264_v3, %s855_s9 }
  0x28   : > { %321 = vrot.lane.b32.xlu0 %v936_v2, %s855_s9  ;;  %323 = vrot.lane.b32.xlu1 %v263_v4, %s855_s9 }
  0x2c   : > { %312 = vrot.lane.b32.xlu0 %v934_v1, %s856_s10  ;;  %314 = vrot.lane.b32.xlu1 %v264_v3, %s856_s10 }
  0x30   : > { %308 = vrot.lane.b32.xlu0 %v936_v2, %s856_s10  ;;  %310 = vrot.lane.b32.xlu1 %v263_v4, %s856_s10 }
  0x34   : > { %299 = vrot.lane.b32.xlu0 %v934_v1, %s857_s11  ;;  %301 = vrot.lane.b32.xlu1 %v264_v3, %s857_s11 }
  0x38   : > { %295 = vrot.lane.b32.xlu0 %v936_v2, %s857_s11  ;;  %297 = vrot.lane.b32.xlu1 %v263_v4, %s857_s11  ;;  %s757_s11 = smul.u32 5, %s1078_s18 }
  0x3c   : > { %286 = vrot.lane.b32.xlu0 %v934_v1, %s858_s12  ;;  %288 = vrot.lane.b32.xlu1 %v264_v3, %s858_s12 }
  0x40   : > { %282 = vrot.lane.b32.xlu0 %v936_v2, %s858_s12  ;;  %284 = vrot.lane.b32.xlu1 %v263_v4, %s858_s12  ;;  %s758_s12 = smul.u32 10, %s1076_s19 }
  0x42   : > { %s258_s13 = sadd.s32 %s758_s12, %s757_s11 }
  0x43   : > { %s721_s14 = sshll.u32 %s258_s13, 3 }
  0x44   : > { %273 = vrot.lane.b32.xlu0 %v934_v1, %s859_s15  ;;  %275 = vrot.lane.b32.xlu1 %v264_v3, %s859_s15  ;;  %s260_s17 = scalar_lea.vmem %s1064_s5, %s721_s14 }
  0x48   : > { %269 = vrot.lane.b32.xlu0 %v936_v2, %s859_s15  ;;  %271 = vrot.lane.b32.xlu1 %v263_v4, %s859_s15 }
  0x4c   : > { %364 = vrot.lane.b32.xlu0 %v934_v1, %s861_s16  ;;  %366 = vrot.lane.b32.xlu1 %v264_v3, %s861_s16 }
  0x50   : > { %360 = vrot.lane.b32.xlu0 %v936_v2, %s861_s16  ;;  %362 = vrot.lane.b32.xlu1 %v263_v4, %s861_s16 }
  0x54   : > { %381 = vperm.xlu1 %811, %v377_v7   ;;  %386 = vperm.xlu0 %810, %v378_v8  }
  0x58   : > { %485 = vperm.xlu1 %811, %v478_v9   ;;  %490 = vperm.xlu0 %810, %v479_v10  }
  0x5c   : > { %495 = vperm.xlu1 %811, %v480_v11   ;;  %500 = vperm.xlu0 %810, %v481_v12   ;;  %v473_v12 = vld [vmem:[%s1062_s3] sm:$0xff] }
  0x60   : > { %505 = vperm.xlu1 %811, %v482_v13   ;;  %v474_v13 = vld [vmem:[%s1062_s3 + $0x8] sm:$0xff] }
  0x86   : > { %v352_v14 = vpop.permute.xlu0 %351  ;;  %v348_v15 = vpop.permute.xlu1 %347 }
  0x8a   : > { %v354_v16 = vpop.permute.xlu0 %353  ;;  %v350_v17 = vpop.permute.xlu1 %349 }
  0x8b   : > { %v357_v18 = vsel %vm355_vm1, %v352_v14, %v354_v16  ;;  %v356_v19 = vsel %vm355_vm1, %v348_v15, %v350_v17  ;;  %v475_v14 = vld [vmem:[%s1062_s3 + $0x10] sm:$0xff]  ;;  %v476_v15 = vld [vmem:[%s1062_s3 + $0x18] sm:$0xff]  ;;  %v477_v16 = vld [vmem:[%s1062_s3 + $0x20] sm:$0xf] }
  0x8c   : > { %397 = vmatpush1.msra.mxu0 %v357_v18 }
  0x8d   : > { %398 = vmatprep.subr.mxu0 %v852_v0 }
  0x8e   : > { %v339_v20 = vpop.permute.xlu0 %338  ;;  %399 = vmatpush1.msra.mxu0 %v356_v19  ;;  %v341_v21 = vpop.permute.xlu1 %340 }
  0x8f   : > { %400 = vmatprep.subr.mxu0 %v852_v0  ;;  %v344_v22 = vsel %vm342_vm2, %v339_v20, %v341_v21 }
  0x90   : > { %401 = vmatpush1.msra.mxu0 %v344_v22 }
  0x91   : > { %402 = vmatprep.subr.mxu0 %v852_v0 }
  0x92   : > { %v335_v23 = vpop.permute.xlu0 %334  ;;  %v337_v24 = vpop.permute.xlu1 %336 }
  0x93   : > { %v343_v25 = vsel %vm342_vm2, %v335_v23, %v337_v24 }
  0x94   : > { %403 = vmatpush1.msra.mxu0 %v343_v25 }
  0x95   : > { %404 = vmatprep.subr.mxu0 %v852_v0 }
  0x96   : > { %v326_v26 = vpop.permute.xlu0 %325  ;;  %v328_v27 = vpop.permute.xlu1 %327 }
  0x97   : > { %v331_v28 = vsel %vm329_vm3, %v326_v26, %v328_v27 }
  0x98   : > { %405 = vmatpush1.msra.mxu0 %v331_v28 }
  0x99   : > { %406 = vmatprep.subr.mxu0 %v852_v0 }
  0x9a   : > { %v322_v29 = vpop.permute.xlu0 %321  ;;  %v324_v30 = vpop.permute.xlu1 %323 }
  0x9b   : > { %v330_v31 = vsel %vm329_vm3, %v322_v29, %v324_v30 }
  0x9c   : > { %407 = vmatpush1.msra.mxu0 %v330_v31 }
  0x9d   : > { %408 = vmatprep.subr.mxu0 %v852_v0 }
  0x9e   : > { %v313_v32 = vpop.permute.xlu0 %312  ;;  %v315_v33 = vpop.permute.xlu1 %314 }
  0x9f   : > { %v318_v34 = vsel %vm316_vm4, %v313_v32, %v315_v33 }
  0xa0   : > { %409 = vmatpush1.msra.mxu0 %v318_v34 }
  0xa1   : > { %410 = vmatprep.subr.mxu0 %v852_v0 }
  0xa2   : > { %v309_v35 = vpop.permute.xlu0 %308  ;;  %v311_v36 = vpop.permute.xlu1 %310 }
  0xa3   : > { %v317_v37 = vsel %vm316_vm4, %v309_v35, %v311_v36 }
  0xa4   : > { %411 = vmatpush1.msra.mxu0 %v317_v37 }
  0xa5   : > { %412 = vmatprep.subr.mxu0 %v852_v0 }
  0xa6   : > { %v300_v38 = vpop.permute.xlu0 %299  ;;  %v302_v39 = vpop.permute.xlu1 %301 }
  0xa7   : > { %v305_v40 = vsel %vm303_vm5, %v300_v38, %v302_v39 }
  0xa8   : > { %413 = vmatpush1.msra.mxu0 %v305_v40 }
  0xa9   : > { %414 = vmatprep.subr.mxu0 %v852_v0 }
  0xaa   : > { %v296_v41 = vpop.permute.xlu0 %295  ;;  %v298_v42 = vpop.permute.xlu1 %297 }
  0xab   : > { %v304_v43 = vsel %vm303_vm5, %v296_v41, %v298_v42 }
  0xac   : > { %415 = vmatpush1.msra.mxu0 %v304_v43 }
  0xad   : > { %416 = vmatprep.subr.mxu0 %v852_v0 }
  0xae   : > { %v287_v44 = vpop.permute.xlu0 %286  ;;  %v289_v45 = vpop.permute.xlu1 %288 }
  0xaf   : > { %v292_v46 = vsel %vm290_vm6, %v287_v44, %v289_v45 }
  0xb0   : > { %417 = vmatpush1.msra.mxu0 %v292_v46 }
  0xb1   : > { %418 = vmatprep.subr.mxu0 %v852_v0 }
  0xb2   : > { %v283_v47 = vpop.permute.xlu0 %282  ;;  %v285_v48 = vpop.permute.xlu1 %284 }
  0xb3   : > { %v291_v49 = vsel %vm290_vm6, %v283_v47, %v285_v48 }
  0xb4   : > { %419 = vmatpush1.msra.mxu0 %v291_v49 }
  0xb5   : > { %420 = vmatprep.subr.mxu0 %v852_v0 }
  0xb6   : > { %v274_v50 = vpop.permute.xlu0 %273  ;;  %v276_v51 = vpop.permute.xlu1 %275 }
  0xb7   : > { %v279_v52 = vsel %vm277_vm7, %v274_v50, %v276_v51 }
  0xb8   : > { %421 = vmatpush1.msra.mxu0 %v279_v52 }
  0xb9   : > { %422 = vmatprep.subr.mxu0 %v852_v0 }
  0xba   : > { %v270_v53 = vpop.permute.xlu0 %269  ;;  %v272_v54 = vpop.permute.xlu1 %271 }
  0xbb   : > { %v278_v55 = vsel %vm277_vm7, %v270_v53, %v272_v54 }
  0xbc   : > { %423 = vmatpush1.msra.mxu0 %v278_v55 }
  0xbd   : > { %424 = vmatprep.subr.mxu0 %v852_v0 }
  0xbe   : > { %v365_v56 = vpop.permute.xlu0 %364  ;;  %425 = vmatpush1.msra.mxu0 %v934_v1  ;;  %v367_v57 = vpop.permute.xlu1 %366  ;;  %v375_v1 = vld [vmem:[%s1060_s1 + $0x10] sm:$0xff] }
  0xbf   : > { %426 = vmatprep.subr.mxu0 %v852_v0  ;;  %v370_v58 = vsel %vm368_vm8, %v365_v56, %v367_v57 }
  0xc0   : > { %427 = vmatpush1.msra.mxu0 %v936_v2 }
  0xc1   : > { %456 = vmatprep.subr.mxu0 %v852_v0 }
  0xc2   : > { %v361_v59 = vpop.permute.xlu0 %360  ;;  %457 = vmatpush2.msra.mxu0 %v370_v58  ;;  %v363_v60 = vpop.permute.xlu1 %362 }
  0xc3   : > { %458 = vmatprep.subr.mxu0 %v852_v0  ;;  %v369_v62 = vsel %vm368_vm8, %v361_v59, %v363_v60 }
  0xc4   : > { %459 = vmatpush2.msra.mxu0 %v369_v62 }
  0xc5   : > { %461 = vmatmul.mubr.f32.vlgmr.msra.gmra.mxu0 %v373_v61 }
  0xc6   : > { %723 = vmatprep.mubr.msk.f32.mxu0 %vm389_vm0, %v376_v63 }
  0xc9   : > { %466 = vmatmul.mubr.f32.gmra.mxu0 %v375_v1 }
  0xcf   : > { %v382_v4 = vpop.permute.xlu1 %381  ;;  %v387_v5 = vpop.permute.xlu0 %386 }
  0xd3   : > { %v486_v17 = vpop.permute.xlu1 %485 }
  0xd7   : > { %v496_v24 = vpop.permute.xlu1 %495 }
  0xdb   : > { %v506_v32 = vpop.permute.xlu1 %505 }
 0x185   : > { %v462_v2 = vpop.f32.mrf.mxu0 }
 0x186   : > { %v463_v7 = vadd.f32 %v462_v2, %v382_v4 }
 0x187   : > { %v464_v3 = vpop.f32.mrf.mxu0 }
 0x188   : > { %v471_v11 = vmax.f32 %v463_v7, 0.0 }
 0x189   : > { %v467_v6 = vpop.f32.mrf.mxu0 }
 0x18a   : > { %v468_v8 = vadd.f32 %v467_v6, %v387_v5 }
 0x18b   : > { %v469_v9 = vpop.f32.mrf.mxu0 }
 0x18c   : > { %v472_v10 = vmax.f32 %v468_v8, 0.0 }
 0x18e   : > { %739 = vmatpush3.msra.mxu1 %v472_v10 }
 0x18f   : > { %740 = vmatprep.subr.mxu1 %v852_v0 }
 0x190   : > { %741 = vmatpush3.msra.mxu1 %v471_v11 }
 0x191   : > { %743 = vmatmul.mubr.msk.f32.vlgmr.msra.gmra.mxu1 %vm389_vm0, %v473_v12 }
 0x192   : > { %745 = vmatprep.mubr.msk.f32.mxu1 %vm862_vm9, %v852_v0 }
 0x195   : > { %746 = vmatmul.mubr.msk.f32.gmra.mxu1 %vm389_vm0, %v474_v13 }
 0x196   : > { %748 = vmatprep.mubr.msk.f32.mxu1 %vm862_vm9, %v852_v0 }
 0x199   : > { %749 = vmatmul.mubr.msk.f32.gmra.mxu1 %vm389_vm0, %v475_v14 }
 0x19a   : > { %751 = vmatprep.mubr.msk.f32.mxu1 %vm862_vm9, %v852_v0 }
 0x19d   : > { %752 = vmatmul.mubr.msk.f32.gmra.mxu1 %vm389_vm0, %v476_v15 }
 0x19e   : > { %754 = vmatprep.mubr.msk.f32.mxu1 %vm862_vm9, %v852_v0  ;;  %v491_v0 = vpop.permute.xlu0 %490 }
 0x1a1   : > { %755 = vmatmul.mubr.msk.f32.gmra.mxu1 %vm389_vm0, %v477_v16 }
 0x1a2   : > { %v501_v28 = vpop.permute.xlu0 %500 }
 0x251   : > { %v589_v18 = vpop.f32.mrf.mxu1 }
 0x252   : > { %v590_v19 = vadd.f32 %v589_v18, %v486_v17 }
 0x253   : > { %v744_v20 = vpop.f32.mrf.mxu1 }
 0x254   : > { %613 = vst [vmem:[%s260_s17] sm:$0xff] %v590_v19 }
 0x255   : > { %v594_v21 = vpop.f32.mrf.mxu1 }
 0x256   : > { %v595_v22 = vadd.f32 %v594_v21, %v491_v0 }
 0x257   : > { %v747_v23 = vpop.f32.mrf.mxu1 }
 0x258   : > { %614 = vst [vmem:[%s260_s17 + $0x8] sm:$0xff] %v595_v22 }
 0x259   : > { %v599_v25 = vpop.f32.mrf.mxu1 }
 0x25a   : > { %v600_v26 = vadd.f32 %v599_v25, %v496_v24 }
 0x25b   : > { %v750_v27 = vpop.f32.mrf.mxu1 }
 0x25c   : > { %615 = vst [vmem:[%s260_s17 + $0x10] sm:$0xff] %v600_v26 }
 0x25d   : > { %v604_v29 = vpop.f32.mrf.mxu1 }
 0x25e   : > { %v605_v30 = vadd.f32 %v604_v29, %v501_v28 }
 0x25f   : > { %v753_v31 = vpop.f32.mrf.mxu1 }
 0x260   : > { %616 = vst [vmem:[%s260_s17 + $0x18] sm:$0xff] %v605_v30 }
 0x261   : > { %v609_v33 = vpop.f32.mrf.mxu1 }
 0x262   : > { %v610_v34 = vadd.f32 %v609_v33, %v506_v32 }
 0x263   : > { %v756_v35 = vpop.f32.mrf.mxu1 }
 0x264   : > { %617 = vst [vmem:[%s260_s17 + $0x20] sm:$0xf] %v610_v34 }
 0x265 PF: > { %s15_s22 = sadd.s32 1, %s850_s22   ;;  %s1065_s18 = smov %s842_s20 }
 0x266   : > { %p12_p7 = scmp.ge.s32.totalorder %s15_s22, 8   ;;  %s1066_s19 = smov %s846_s21 }
 0x267   : > { %s1067_s20 = smov %s1070_s23  ;;  %s1068_s21 = smov %s1074_s24 }
 0x268   :  { %14 = sbr.rel (!%p12_p7) target bundleno = 3 (0x3), region = 70 }

</bundles_post_ra>
